<compile_context>
chip_gen: v7x
topology: tpu7x:2x2x1
jax: 0.10.0
libtpu: 0.0.40
codegen_flags: <defaults>
</compile_context>

<pallas_src>
import jax
import jax.numpy as jnp
from jax import lax
from jax.experimental import pallas as pl
from jax.experimental.pallas import tpu as pltpu


def denoise_kernel(x_ref, t0_ref, t1_ref, t2_ref, b1_ref,
                   w2_ref, b2_ref, wfc1_ref, bfc1_ref,
                   wfc2_ref, bfc2_ref, wfc3_ref, bfc3_ref, out_ref):
    f32 = jnp.float32
    bf16 = jnp.bfloat16

    xp = x_ref[...]                      # (L+2, TB) f32, zero halo rows
    L = xp.shape[0] - 2
    C = b1_ref.shape[0] // L

    # ---- conv1 (1->C, k=3, pad=1) on the VPU (no MXU pass) ----
    # Three sublane-shifted views of x, tiled to (C*L, TB); per-row tap
    # columns (t0/t1/t2) carry w1[c, 0, k] repeated L times, so
    # h1[c*L + l] = w1[c,0,0]*x[l-1] + w1[c,0,1]*x[l] + w1[c,0,2]*x[l+1] + b1[c]
    x_m1 = jnp.concatenate([xp[0:L, :]] * C, axis=0)        # x[l-1] (0-padded)
    x_0 = jnp.concatenate([xp[1:L + 1, :]] * C, axis=0)     # x[l]
    x_p1 = jnp.concatenate([xp[2:L + 2, :]] * C, axis=0)    # x[l+1] (0-padded)
    h1 = (t0_ref[...] * x_m1 + t1_ref[...] * x_0
          + t2_ref[...] * x_p1 + b1_ref[...])
    h1 = jnp.maximum(h1, 0.0).astype(bf16)                  # (C*L, TB)

    # ---- conv2 (C->C, k=3, pad=1) as one banded-matrix MXU matmul ----
    h2 = jnp.dot(w2_ref[...], h1, preferred_element_type=f32) + b2_ref[...]
    h2 = jnp.maximum(h2, 0.0).astype(bf16)                  # (C*L, TB)

    # ---- fc1 / fc2 / fc3 (torch (out, in) orientation, bf16 operands) ----
    z1 = jnp.dot(wfc1_ref[...], h2, preferred_element_type=f32) + bfc1_ref[...]
    z1 = jnp.maximum(z1, 0.0).astype(bf16)                  # (H1, TB)
    z2 = jnp.dot(wfc2_ref[...], z1, preferred_element_type=f32) + bfc2_ref[...]
    z2 = jnp.maximum(z2, 0.0).astype(bf16)                  # (H2, TB)
    out_ref[...] = (jnp.dot(wfc3_ref[...], z2, preferred_element_type=f32)
                    + bfc3_ref[...])                        # (1, TB) f32


def _conv_band_matrix(w_ock, L):
    """(O, Cin, 3) conv weight -> (O*L, Cin*L) banded matrix M with
    M[o*L + l, c*L + l'] = w_ock[o, c, l' - l + 1] when the tap is in range
    (implements kernel_size=3, padding=1, stride=1)."""
    O, Cin, K = w_ock.shape
    l = jnp.arange(L)
    k = l[None, :] - l[:, None] + (K // 2)                  # (L_out, L_in)
    valid = (k >= 0) & (k < K)
    taps = jnp.take(w_ock, jnp.clip(k, 0, K - 1), axis=2)   # (O, Cin, L, L)
    taps = taps * valid[None, None].astype(w_ock.dtype)
    return jnp.transpose(taps, (0, 2, 1, 3)).reshape(O * L, Cin * L)


def denoising_forward(x, params):
    """x: (B, 1, L) float32.  Returns (B, 1) float32."""
    B, _, L = x.shape
    w1, b1, w2, b2, wfc1, bfc1, wfc2, bfc2, wfc3, bfc3 = params
    C = w1.shape[0]
    CL = C * L
    H1, H2 = bfc1.shape[0], bfc2.shape[0]
    bf16 = jnp.bfloat16

    # ---- parameter re-layout (plain JAX glue, done once) ----
    # conv1: per-row tap columns + bias column (VPU path in the kernel).
    t0_col = jnp.repeat(w1[:, 0, 0], L).reshape(CL, 1)
    t1_col = jnp.repeat(w1[:, 0, 1], L).reshape(CL, 1)
    t2_col = jnp.repeat(w1[:, 0, 2], L).reshape(CL, 1)
    b1_col = jnp.repeat(b1, L).reshape(CL, 1)
    # conv2 as a banded dense matrix; matmul weights in bf16 (MXU-native).
    w2_mat = _conv_band_matrix(w2, L).astype(bf16)           # (C*L, C*L)
    wfc1_b = wfc1.astype(bf16)
    wfc2_b = wfc2.astype(bf16)
    wfc3_b = wfc3.astype(bf16)
    b2_col = jnp.repeat(b2, L).reshape(CL, 1)
    bfc1_c = bfc1.reshape(H1, 1)
    bfc2_c = bfc2.reshape(H2, 1)
    bfc3_c = bfc3.reshape(1, 1)

    # ---- batch tiling: batch is the (lane) last axis everywhere ----
    LANE = 128
    TB_CAP = 2048          # VMEM is comfortable well past this on all gens
    NUM_CORES = 2          # balance tiles across v7x's two TensorCores
    ntiles = pl.cdiv(B, TB_CAP)
    if B > LANE * NUM_CORES:
        ntiles = pl.cdiv(ntiles, NUM_CORES) * NUM_CORES
    TB = pl.cdiv(pl.cdiv(B, ntiles), LANE) * LANE
    B_pad = ntiles * TB

    xb = x.reshape(B, L)
    if B_pad != B:
        xb = jnp.pad(xb, ((0, B_pad - B), (0, 0)))
    # (L+2, B_pad) with zero halo rows so conv1's pad=1 is pure slicing.
    xT = jnp.pad(xb.T, ((1, 1), (0, 0)))

    def const_spec(*shape):
        zeros = (0,) * len(shape)
        return pl.BlockSpec(shape, lambda i: zeros)

    out = pl.pallas_call(
        denoise_kernel,
        out_shape=jax.ShapeDtypeStruct((1, B_pad), jnp.float32),
        grid=(ntiles,),
        in_specs=[
            pl.BlockSpec((L + 2, TB), lambda i: (0, i)),    # x tile (halo'd)
            const_spec(CL, 1),                              # conv1 tap 0
            const_spec(CL, 1),                              # conv1 tap 1
            const_spec(CL, 1),                              # conv1 tap 2
            const_spec(CL, 1),                              # conv1 bias
            const_spec(CL, CL),                             # conv2 banded (bf16)
            const_spec(CL, 1),                              # conv2 bias
            const_spec(H1, CL),                             # fc1 weight (bf16)
            const_spec(H1, 1),                              # fc1 bias
            const_spec(H2, H1),                             # fc2 weight (bf16)
            const_spec(H2, 1),                              # fc2 bias
            const_spec(1, H2),                              # fc3 weight (bf16)
            const_spec(1, 1),                               # fc3 bias
        ],
        out_specs=pl.BlockSpec((1, TB), lambda i: (0, i)),  # lane-dense output
        compiler_params=pltpu.CompilerParams(
            dimension_semantics=("parallel",),
            vmem_limit_bytes=64 * 1024 * 1024),
    )(xT, t0_col, t1_col, t2_col, b1_col, w2_mat, b2_col,
      wfc1_b, bfc1_c, wfc2_b, bfc2_c, wfc3_b, bfc3_c)
    return out[0, :B].reshape(B, 1)


def reference_forward(x, params):
    """Pure-JAX (f32) reference mirroring the PyTorch forward."""
    w1, b1, w2, b2, wfc1, bfc1, wfc2, bfc2, wfc3, bfc3 = params
    dn = ('NCH', 'OIH', 'NCH')
    hp = lax.Precision.HIGHEST
    relu = lambda v: jnp.maximum(v, 0.0)
    h = lax.conv_general_dilated(x, w1, (1,), [(1, 1)],
                                 dimension_numbers=dn, precision=hp)
    h = relu(h + b1[None, :, None])
    h = lax.conv_general_dilated(h, w2, (1,), [(1, 1)],
                                 dimension_numbers=dn, precision=hp)
    h = relu(h + b2[None, :, None])
    f = h.reshape(h.shape[0], -1)
    f = relu(jnp.dot(f, wfc1.T, precision=hp) + bfc1)
    f = relu(jnp.dot(f, wfc2.T, precision=hp) + bfc2)
    return jnp.dot(f, wfc3.T, precision=hp) + bfc3


if __name__ == "__main__":
    L, C, H1, H2 = 16, 16, 64, 64     # input_size=16, hidden sizes = defaults
    key = jax.random.PRNGKey(0)
    ks = jax.random.split(key, 11)
    params = (
        jax.random.normal(ks[0], (C, 1, 3), jnp.float32) * 0.2,     # conv1.weight
        jax.random.normal(ks[1], (C,), jnp.float32) * 0.05,         # conv1.bias
        jax.random.normal(ks[2], (C, C, 3), jnp.float32) * 0.1,     # cnv2.weight
        jax.random.normal(ks[3], (C,), jnp.float32) * 0.05,         # cnv2.bias
        jax.random.normal(ks[4], (H1, C * L), jnp.float32) * 0.05,  # fc1.weight
        jax.random.normal(ks[5], (H1,), jnp.float32) * 0.05,        # fc1.bias
        jax.random.normal(ks[6], (H2, H1), jnp.float32) * 0.1,      # fc2.weight
        jax.random.normal(ks[7], (H2,), jnp.float32) * 0.05,        # fc2.bias
        jax.random.normal(ks[8], (1, H2), jnp.float32) * 0.1,       # fc3.weight
        jax.random.normal(ks[9], (1,), jnp.float32) * 0.05,         # fc3.bias
    )

    # B=2: small demo shape. B=2500: exercises multi-tile grid + batch padding
    # (2 tiles of 1280 -> balanced across v7x's two TensorCores).
    for B in (2, 2500):
        x = jax.random.normal(jax.random.fold_in(ks[10], B), (B, 1, L),
                              jnp.float32)
        out = jax.block_until_ready(denoising_forward(x, params))
        ref = reference_forward(x, params)
        assert out.shape == (B, 1), out.shape
        # bf16 matmul operands (f32 accumulation) -> slightly looser check.
        assert jnp.allclose(out, ref, atol=2e-2, rtol=2e-2), (
            float(jnp.max(jnp.abs(out - ref))))
    print("KERNEL_OK")
</pallas_src>

<mosaic_0001>
module attributes {stable_mosaic.version = 11 : i64} {
  func.func @denoise_kernel(%arg0: i32, %arg1: memref<18x128xf32, #tpu.memory_space<vmem>>, %arg2: memref<256x1xf32, #tpu.memory_space<vmem>>, %arg3: memref<256x1xf32, #tpu.memory_space<vmem>>, %arg4: memref<256x1xf32, #tpu.memory_space<vmem>>, %arg5: memref<256x1xf32, #tpu.memory_space<vmem>>, %arg6: memref<256x256xbf16, #tpu.memory_space<vmem>>, %arg7: memref<256x1xf32, #tpu.memory_space<vmem>>, %arg8: memref<64x256xbf16, #tpu.memory_space<vmem>>, %arg9: memref<64x1xf32, #tpu.memory_space<vmem>>, %arg10: memref<64x64xbf16, #tpu.memory_space<vmem>>, %arg11: memref<64x1xf32, #tpu.memory_space<vmem>>, %arg12: memref<1x64xbf16, #tpu.memory_space<vmem>>, %arg13: memref<1x1xf32, #tpu.memory_space<vmem>>, %arg14: memref<1x128xf32, #tpu.memory_space<vmem>>) attributes {dimension_semantics = [#tpu.dimension_semantics<parallel>], iteration_bounds = array<i64: 1>, scalar_prefetch = 0 : i64, scratch_operands = 0 : i64, tpu.core_type = #tpu.core_type<tc>, window_params = [{transform_indices = @transform_0, window_bounds = array<i64: 18, 128>}, {pipeline_mode = #tpu.pipeline_mode<synchronous>, transform_indices = @transform_1, window_bounds = array<i64: 256, 1>}, {pipeline_mode = #tpu.pipeline_mode<synchronous>, transform_indices = @transform_2, window_bounds = array<i64: 256, 1>}, {pipeline_mode = #tpu.pipeline_mode<synchronous>, transform_indices = @transform_3, window_bounds = array<i64: 256, 1>}, {pipeline_mode = #tpu.pipeline_mode<synchronous>, transform_indices = @transform_4, window_bounds = array<i64: 256, 1>}, {pipeline_mode = #tpu.pipeline_mode<synchronous>, transform_indices = @transform_5, window_bounds = array<i64: 256, 256>}, {pipeline_mode = #tpu.pipeline_mode<synchronous>, transform_indices = @transform_6, window_bounds = array<i64: 256, 1>}, {pipeline_mode = #tpu.pipeline_mode<synchronous>, transform_indices = @transform_7, window_bounds = array<i64: 64, 256>}, {pipeline_mode = #tpu.pipeline_mode<synchronous>, transform_indices = @transform_8, window_bounds = array<i64: 64, 1>}, {pipeline_mode = #tpu.pipeline_mode<synchronous>, transform_indices = @transform_9, window_bounds = array<i64: 64, 64>}, {pipeline_mode = #tpu.pipeline_mode<synchronous>, transform_indices = @transform_10, window_bounds = array<i64: 64, 1>}, {pipeline_mode = #tpu.pipeline_mode<synchronous>, transform_indices = @transform_11, window_bounds = array<i64: 1, 64>}, {pipeline_mode = #tpu.pipeline_mode<synchronous>, transform_indices = @transform_12, window_bounds = array<i64: 1, 1>}, {transform_indices = @transform_13, window_bounds = array<i64: 1, 128>}]} {
    %c0 = arith.constant 0 : index
    %c0_0 = arith.constant 0 : index
    %0 = vector.load %arg1[%c0, %c0_0] : memref<18x128xf32, #tpu.memory_space<vmem>>, vector<18x128xf32>
    %1 = vector.extract_strided_slice %0 {offsets = [0, 0], sizes = [16, 128], strides = [1, 1]} : vector<18x128xf32> to vector<16x128xf32>
    %2 = tpu.concatenate %1, %1, %1, %1, %1, %1, %1, %1, %1, %1, %1, %1, %1, %1, %1, %1 in 0 : vector<16x128xf32>, vector<16x128xf32>, vector<16x128xf32>, vector<16x128xf32>, vector<16x128xf32>, vector<16x128xf32>, vector<16x128xf32>, vector<16x128xf32>, vector<16x128xf32>, vector<16x128xf32>, vector<16x128xf32>, vector<16x128xf32>, vector<16x128xf32>, vector<16x128xf32>, vector<16x128xf32>, vector<16x128xf32> -> vector<256x128xf32>
    %3 = vector.extract_strided_slice %0 {offsets = [1, 0], sizes = [16, 128], strides = [1, 1]} : vector<18x128xf32> to vector<16x128xf32>
    %4 = tpu.concatenate %3, %3, %3, %3, %3, %3, %3, %3, %3, %3, %3, %3, %3, %3, %3, %3 in 0 : vector<16x128xf32>, vector<16x128xf32>, vector<16x128xf32>, vector<16x128xf32>, vector<16x128xf32>, vector<16x128xf32>, vector<16x128xf32>, vector<16x128xf32>, vector<16x128xf32>, vector<16x128xf32>, vector<16x128xf32>, vector<16x128xf32>, vector<16x128xf32>, vector<16x128xf32>, vector<16x128xf32>, vector<16x128xf32> -> vector<256x128xf32>
    %5 = vector.extract_strided_slice %0 {offsets = [2, 0], sizes = [16, 128], strides = [1, 1]} : vector<18x128xf32> to vector<16x128xf32>
    %6 = tpu.concatenate %5, %5, %5, %5, %5, %5, %5, %5, %5, %5, %5, %5, %5, %5, %5, %5 in 0 : vector<16x128xf32>, vector<16x128xf32>, vector<16x128xf32>, vector<16x128xf32>, vector<16x128xf32>, vector<16x128xf32>, vector<16x128xf32>, vector<16x128xf32>, vector<16x128xf32>, vector<16x128xf32>, vector<16x128xf32>, vector<16x128xf32>, vector<16x128xf32>, vector<16x128xf32>, vector<16x128xf32>, vector<16x128xf32> -> vector<256x128xf32>
    %c0_1 = arith.constant 0 : index
    %c0_2 = arith.constant 0 : index
    %7 = vector.load %arg2[%c0_1, %c0_2] : memref<256x1xf32, #tpu.memory_space<vmem>>, vector<256x1xf32>
    %8 = vector.broadcast %7 : vector<256x1xf32> to vector<256x128xf32>
    %9 = arith.mulf %8, %2 : vector<256x128xf32>
    %c0_3 = arith.constant 0 : index
    %c0_4 = arith.constant 0 : index
    %10 = vector.load %arg3[%c0_3, %c0_4] : memref<256x1xf32, #tpu.memory_space<vmem>>, vector<256x1xf32>
    %11 = vector.broadcast %10 : vector<256x1xf32> to vector<256x128xf32>
    %12 = arith.mulf %11, %4 : vector<256x128xf32>
    %13 = arith.addf %9, %12 : vector<256x128xf32>
    %c0_5 = arith.constant 0 : index
    %c0_6 = arith.constant 0 : index
    %14 = vector.load %arg4[%c0_5, %c0_6] : memref<256x1xf32, #tpu.memory_space<vmem>>, vector<256x1xf32>
    %15 = vector.broadcast %14 : vector<256x1xf32> to vector<256x128xf32>
    %16 = arith.mulf %15, %6 : vector<256x128xf32>
    %17 = arith.addf %13, %16 : vector<256x128xf32>
    %c0_7 = arith.constant 0 : index
    %c0_8 = arith.constant 0 : index
    %18 = vector.load %arg5[%c0_7, %c0_8] : memref<256x1xf32, #tpu.memory_space<vmem>>, vector<256x1xf32>
    %19 = vector.broadcast %18 : vector<256x1xf32> to vector<256x128xf32>
    %20 = arith.addf %17, %19 : vector<256x128xf32>
    %cst = arith.constant 0.000000e+00 : f32
    %21 = vector.broadcast %cst : f32 to vector<256x128xf32>
    %22 = arith.maximumf %20, %21 : vector<256x128xf32>
    %23 = arith.truncf %22 : vector<256x128xf32> to vector<256x128xbf16>
    %c0_9 = arith.constant 0 : index
    %c0_10 = arith.constant 0 : index
    %24 = vector.load %arg6[%c0_9, %c0_10] : memref<256x256xbf16, #tpu.memory_space<vmem>>, vector<256x256xbf16>
    %cst_11 = arith.constant dense<0.000000e+00> : vector<256x128xf32>
    %25 = tpu.matmul %24, %23, %cst_11 {dimension_numbers = #tpu.dot_dimension_numbers<[1], [0], [0], [1], [0, 0, 1, 1], [], []>} : vector<256x256xbf16>, vector<256x128xbf16>, vector<256x128xf32> -> vector<256x128xf32>
    %c0_12 = arith.constant 0 : index
    %c0_13 = arith.constant 0 : index
    %26 = vector.load %arg7[%c0_12, %c0_13] : memref<256x1xf32, #tpu.memory_space<vmem>>, vector<256x1xf32>
    %27 = vector.broadcast %26 : vector<256x1xf32> to vector<256x128xf32>
    %28 = arith.addf %25, %27 : vector<256x128xf32>
    %cst_14 = arith.constant 0.000000e+00 : f32
    %29 = vector.broadcast %cst_14 : f32 to vector<256x128xf32>
    %30 = arith.maximumf %28, %29 : vector<256x128xf32>
    %31 = arith.truncf %30 : vector<256x128xf32> to vector<256x128xbf16>
    %c0_15 = arith.constant 0 : index
    %c0_16 = arith.constant 0 : index
    %32 = vector.load %arg8[%c0_15, %c0_16] : memref<64x256xbf16, #tpu.memory_space<vmem>>, vector<64x256xbf16>
    %cst_17 = arith.constant dense<0.000000e+00> : vector<64x128xf32>
    %33 = tpu.matmul %32, %31, %cst_17 {dimension_numbers = #tpu.dot_dimension_numbers<[1], [0], [0], [1], [0, 0, 1, 1], [], []>} : vector<64x256xbf16>, vector<256x128xbf16>, vector<64x128xf32> -> vector<64x128xf32>
    %c0_18 = arith.constant 0 : index
    %c0_19 = arith.constant 0 : index
    %34 = vector.load %arg9[%c0_18, %c0_19] : memref<64x1xf32, #tpu.memory_space<vmem>>, vector<64x1xf32>
    %35 = vector.broadcast %34 : vector<64x1xf32> to vector<64x128xf32>
    %36 = arith.addf %33, %35 : vector<64x128xf32>
    %cst_20 = arith.constant 0.000000e+00 : f32
    %37 = vector.broadcast %cst_20 : f32 to vector<64x128xf32>
    %38 = arith.maximumf %36, %37 : vector<64x128xf32>
    %39 = arith.truncf %38 : vector<64x128xf32> to vector<64x128xbf16>
    %c0_21 = arith.constant 0 : index
    %c0_22 = arith.constant 0 : index
    %40 = vector.load %arg10[%c0_21, %c0_22] : memref<64x64xbf16, #tpu.memory_space<vmem>>, vector<64x64xbf16>
    %cst_23 = arith.constant dense<0.000000e+00> : vector<64x128xf32>
    %41 = tpu.matmul %40, %39, %cst_23 {dimension_numbers = #tpu.dot_dimension_numbers<[1], [0], [0], [1], [0, 0, 1, 1], [], []>} : vector<64x64xbf16>, vector<64x128xbf16>, vector<64x128xf32> -> vector<64x128xf32>
    %c0_24 = arith.constant 0 : index
    %c0_25 = arith.constant 0 : index
    %42 = vector.load %arg11[%c0_24, %c0_25] : memref<64x1xf32, #tpu.memory_space<vmem>>, vector<64x1xf32>
    %43 = vector.broadcast %42 : vector<64x1xf32> to vector<64x128xf32>
    %44 = arith.addf %41, %43 : vector<64x128xf32>
    %cst_26 = arith.constant 0.000000e+00 : f32
    %45 = vector.broadcast %cst_26 : f32 to vector<64x128xf32>
    %46 = arith.maximumf %44, %45 : vector<64x128xf32>
    %47 = arith.truncf %46 : vector<64x128xf32> to vector<64x128xbf16>
    %c0_27 = arith.constant 0 : index
    %c0_28 = arith.constant 0 : index
    %48 = vector.load %arg12[%c0_27, %c0_28] : memref<1x64xbf16, #tpu.memory_space<vmem>>, vector<1x64xbf16>
    %cst_29 = arith.constant dense<0.000000e+00> : vector<1x128xf32>
    %49 = tpu.matmul %48, %47, %cst_29 {dimension_numbers = #tpu.dot_dimension_numbers<[1], [0], [0], [1], [0, 0, 1, 1], [], []>} : vector<1x64xbf16>, vector<64x128xbf16>, vector<1x128xf32> -> vector<1x128xf32>
    %c0_30 = arith.constant 0 : index
    %c0_31 = arith.constant 0 : index
    %50 = vector.load %arg13[%c0_30, %c0_31] : memref<1x1xf32, #tpu.memory_space<vmem>>, vector<1x1xf32>
    %51 = vector.broadcast %50 : vector<1x1xf32> to vector<1x128xf32>
    %52 = arith.addf %49, %51 : vector<1x128xf32>
    %c0_32 = arith.constant 0 : index
    %c0_33 = arith.constant 0 : index
    %53 = vector.load %arg14[%c0_32, %c0_33] : memref<1x128xf32, #tpu.memory_space<vmem>>, vector<1x128xf32>
    tpu.vector_store %arg14[%c0_32, %c0_33], %52 {strides = array<i32>} : memref<1x128xf32, #tpu.memory_space<vmem>>, vector<1x128xf32>,
    return
  }
  func.func @transform_0(%arg0: i32) -> (i32, i32) {
    %c0_i32 = arith.constant 0 : i32
    %c0_i32_0 = arith.constant 0 : i32
    return %c0_i32, %arg0 : i32, i32
  }
  func.func @transform_1(%arg0: i32) -> (i32, i32) {
    %c0_i32 = arith.constant 0 : i32
    %c0_i32_0 = arith.constant 0 : i32
    %c0_i32_1 = arith.constant 0 : i32
    return %c0_i32, %c0_i32_0 : i32, i32
  }
  func.func @transform_2(%arg0: i32) -> (i32, i32) {
    %c0_i32 = arith.constant 0 : i32
    %c0_i32_0 = arith.constant 0 : i32
    %c0_i32_1 = arith.constant 0 : i32
    return %c0_i32, %c0_i32_0 : i32, i32
  }
  func.func @transform_3(%arg0: i32) -> (i32, i32) {
    %c0_i32 = arith.constant 0 : i32
    %c0_i32_0 = arith.constant 0 : i32
    %c0_i32_1 = arith.constant 0 : i32
    return %c0_i32, %c0_i32_0 : i32, i32
  }
  func.func @transform_4(%arg0: i32) -> (i32, i32) {
    %c0_i32 = arith.constant 0 : i32
    %c0_i32_0 = arith.constant 0 : i32
    %c0_i32_1 = arith.constant 0 : i32
    return %c0_i32, %c0_i32_0 : i32, i32
  }
  func.func @transform_5(%arg0: i32) -> (i32, i32) {
    %c0_i32 = arith.constant 0 : i32
    %c0_i32_0 = arith.constant 0 : i32
    %c0_i32_1 = arith.constant 0 : i32
    return %c0_i32, %c0_i32_0 : i32, i32
  }
  func.func @transform_6(%arg0: i32) -> (i32, i32) {
    %c0_i32 = arith.constant 0 : i32
    %c0_i32_0 = arith.constant 0 : i32
    %c0_i32_1 = arith.constant 0 : i32
    return %c0_i32, %c0_i32_0 : i32, i32
  }
  func.func @transform_7(%arg0: i32) -> (i32, i32) {
    %c0_i32 = arith.constant 0 : i32
    %c0_i32_0 = arith.constant 0 : i32
    %c0_i32_1 = arith.constant 0 : i32
    return %c0_i32, %c0_i32_0 : i32, i32
  }
  func.func @transform_8(%arg0: i32) -> (i32, i32) {
    %c0_i32 = arith.constant 0 : i32
    %c0_i32_0 = arith.constant 0 : i32
    %c0_i32_1 = arith.constant 0 : i32
    return %c0_i32, %c0_i32_0 : i32, i32
  }
  func.func @transform_9(%arg0: i32) -> (i32, i32) {
    %c0_i32 = arith.constant 0 : i32
    %c0_i32_0 = arith.constant 0 : i32
    %c0_i32_1 = arith.constant 0 : i32
    return %c0_i32, %c0_i32_0 : i32, i32
  }
  func.func @transform_10(%arg0: i32) -> (i32, i32) {
    %c0_i32 = arith.constant 0 : i32
    %c0_i32_0 = arith.constant 0 : i32
    %c0_i32_1 = arith.constant 0 : i32
    return %c0_i32, %c0_i32_0 : i32, i32
  }
  func.func @transform_11(%arg0: i32) -> (i32, i32) {
    %c0_i32 = arith.constant 0 : i32
    %c0_i32_0 = arith.constant 0 : i32
    %c0_i32_1 = arith.constant 0 : i32
    return %c0_i32, %c0_i32_0 : i32, i32
  }
  func.func @transform_12(%arg0: i32) -> (i32, i32) {
    %c0_i32 = arith.constant 0 : i32
    %c0_i32_0 = arith.constant 0 : i32
    %c0_i32_1 = arith.constant 0 : i32
    return %c0_i32, %c0_i32_0 : i32, i32
  }
  func.func @transform_13(%arg0: i32) -> (i32, i32) {
    %c0_i32 = arith.constant 0 : i32
    %c0_i32_0 = arith.constant 0 : i32
    return %c0_i32, %arg0 : i32, i32
  }
}

</mosaic_0001>

<bundles_post_ra>
// kernel: tpu_custom_call.1
= control target key start
LH: loop header
LB: loop body
LE: loop exit
PB: predicated region body
PF: predicated region fallthrough
CT: control target
= control target key end

     0   :  { %s3627_s0 = inlined_call_operand.hbm [shape: f32[18,128], index: 0, kind: input, shape index: {}]   ;;  %s3628_s1 = inlined_call_operand.hbm [shape: f32[256,1], index: 1, kind: input, shape index: {}]   ;;  %s3629_s2 = inlined_call_operand.hbm [shape: f32[256,1], index: 2, kind: input, shape index: {}]   ;;  %s3630_s3 = inlined_call_operand.hbm [shape: f32[256,1], index: 3, kind: input, shape index: {}]   ;;  %s3631_s4 = inlined_call_operand.hbm [shape: f32[256,1], index: 4, kind: input, shape index: {}]   ;;  %s3632_s5 = inlined_call_operand.hbm [shape: bf16[256,256], index: 5, kind: input, shape index: {}]   ;;  %s3633_s6 = inlined_call_operand.hbm [shape: f32[256,1], index: 6, kind: input, shape index: {}]   ;;  %s3634_s7 = inlined_call_operand.hbm [shape: bf16[64,256], index: 7, kind: input, shape index: {}]   ;;  %s3635_s8 = inlined_call_operand.hbm [shape: f32[64,1], index: 8, kind: input, shape index: {}]   ;;  %s3636_s9 = inlined_call_operand.hbm [shape: bf16[64,64], index: 9, kind: input, shape index: {}]   ;;  %s3637_s10 = inlined_call_operand.hbm [shape: f32[64,1], index: 10, kind: input, shape index: {}]   ;;  %s3638_s11 = inlined_call_operand.hbm [shape: bf16[1,64], index: 11, kind: input, shape index: {}]   ;;  %s3639_s12 = inlined_call_operand.<no memory space> [shape: f32[1,1], index: 12, kind: input, shape index: {}]   ;;  %s3640_s13 = inlined_call_operand.hbm [shape: f32[1,128], index: 13, kind: output, shape index: {}]  }
   0x1   :  { %v18_v0 = vstv %s3639_s12 }
   0x2   :  { %19 = vst [vmem:[#allocation2] sm:$0x1] %v18_v0 }
   0x3   :  { %20 = vsyncpa [#allocation4], 0 }
   0x4   :  { %21 = vsyncpa [#allocation7], 0 }
   0x5   :  { %22 = vsyncpa [#allocation10], 0 }
   0x6   :  { %23 = vsyncpa [#allocation13], 0 }
   0x7   :  { %24 = vsyncpa [#allocation16], 0 }
   0x8   :  { %25 = vsyncpa [#allocation19], 0 }
   0x9   :  { %26 = vsyncpa [#allocation22], 0 }
   0xa   :  { %27 = vsyncpa [#allocation5], 0  ;;  %s2895_s27 = smov [#allocation6]   ;;  %s2896_s29 = smov [#allocation9]  }
   0xb   :  { %s45_s28 = sshll.u32 %s2895_s27, 4  ;;  %s69_s30 = sshll.u32 %s2896_s29, 4  ;;  %s46_s28 = int_to_ptr.vmem [resolvable:$true] %s45_s28  ;;  %s2988_s30 = int_to_ptr.vmem [resolvable:$true] %s69_s30 }
   0xc   :  { %s2593_s12 = scalar_lea.hbm %s3628_s1, 4096 }
   0xd   :  { %p2594_p0 = scmp.ne.s32.totalorder %s3628_s1, %s2593_s12  ;;  %p2597_p1 = scmp.lt.u32.totalorder %s2593_s12, %s3628_s1 }
   0xf   :  { %p2599_p2 = pnand %p2597_p1, %p2594_p0 }
  0x11   :  { %2602 = shalt.err (!%p2599_p2)
}
  0x12   :  { %s2603_s20 = scalar_lea.vmem %s46_s28, 4096  ;;  %p2608_p4 = scmp.lt.s32.totalorder %s46_s28, %s46_s28 }
  0x13   :  { %p2604_p3 = scmp.ne.s32.totalorder %s46_s28, %s2603_s20  ;;  %p2609_p5 = scmp.lt.s32.totalorder %s2603_s20, %s2603_s20 }
  0x15   :  { %p2610_p6 = por %p2609_p5, %p2608_p4 }
  0x17   :  { %p2611_p7 = pnand %p2610_p6, %p2604_p3 }
  0x19   :  { %2614 = shalt.err (!%p2611_p7)
}
  0x1a   :  { %s2897_s21 = smov 128   ;;  %s2898_s22 = smov 8  }
  0x1b   :  { %51 = dma.hbm_to_vmem [thread:$0]  %s3628_s1, 4096, %s46_s28, [#allocation7], %s2897_s21, %s2897_s21, %s2898_s22  }
  0x1c   :  { %s2615_s27 = scalar_lea.hbm %s3630_s3, 4096 }
  0x1d   :  { %p2616_p8 = scmp.ne.s32.totalorder %s3630_s3, %s2615_s27  ;;  %p2619_p9 = scmp.lt.u32.totalorder %s2615_s27, %s3630_s3 }
  0x1f   :  { %p2621_p10 = pnand %p2619_p9, %p2616_p8 }
  0x21   :  { %2624 = shalt.err (!%p2621_p10)
}
  0x22   :  { %s2625_s16 = scalar_lea.vmem %s2988_s30, 4096  ;;  %p2630_p12 = scmp.lt.s32.totalorder %s2988_s30, %s2988_s30 }
  0x23   :  { %p2626_p11 = scmp.ne.s32.totalorder %s2988_s30, %s2625_s16  ;;  %p2631_p13 = scmp.lt.s32.totalorder %s2625_s16, %s2625_s16 }
  0x25   :  { %p2632_p0 = por %p2631_p13, %p2630_p12 }
  0x27   :  { %p2633_p1 = pnand %p2632_p0, %p2626_p11 }
  0x29   :  { %2636 = shalt.err (!%p2633_p1)
}
  0x2a   :  { %75 = dma.hbm_to_vmem [thread:$0]  %s3630_s3, 4096, %s2988_s30, [#allocation10], %s2897_s21, %s2897_s21, %s2898_s22  }
  0x2b   :  { %s2899_s17 = smov [#allocation12]   ;;  %s2900_s19 = smov [#allocation15]  }
  0x2c   :  { %s93_s18 = sshll.u32 %s2899_s17, 4  ;;  %s117_s20 = sshll.u32 %s2900_s19, 4  ;;  %s94_s18 = int_to_ptr.vmem [resolvable:$true] %s93_s18  ;;  %s3025_s20 = int_to_ptr.vmem [resolvable:$true] %s117_s20 }
  0x2d   :  { %s2637_s25 = scalar_lea.hbm %s3632_s5, 4096 }
  0x2e   :  { %p2638_p2 = scmp.ne.s32.totalorder %s3632_s5, %s2637_s25  ;;  %p2641_p3 = scmp.lt.u32.totalorder %s2637_s25, %s3632_s5 }
  0x30   :  { %p2643_p4 = pnand %p2641_p3, %p2638_p2 }
  0x32   :  { %2646 = shalt.err (!%p2643_p4)
}
  0x33   :  { %s2647_s3 = scalar_lea.vmem %s94_s18, 4096  ;;  %p2652_p6 = scmp.lt.s32.totalorder %s94_s18, %s94_s18 }
  0x34   :  { %p2648_p5 = scmp.ne.s32.totalorder %s94_s18, %s2647_s3  ;;  %p2653_p7 = scmp.lt.s32.totalorder %s2647_s3, %s2647_s3 }
  0x36   :  { %p2654_p8 = por %p2653_p7, %p2652_p6 }
  0x38   :  { %p2655_p9 = pnand %p2654_p8, %p2648_p5 }
  0x3a   :  { %2658 = shalt.err (!%p2655_p9)
}
  0x3b   :  { %99 = dma.hbm_to_vmem [thread:$0]  %s3632_s5, 4096, %s94_s18, [#allocation13], %s2897_s21, %s2897_s21, %s2898_s22  }
  0x3c   :  { %s2659_s1 = scalar_lea.hbm %s3634_s7, 1024 }
  0x3d   :  { %p2660_p10 = scmp.ne.s32.totalorder %s3634_s7, %s2659_s1  ;;  %p2663_p11 = scmp.lt.u32.totalorder %s2659_s1, %s3634_s7 }
  0x3f   :  { %p2665_p12 = pnand %p2663_p11, %p2660_p10 }
  0x41   :  { %2668 = shalt.err (!%p2665_p12)
}
  0x42   :  { %s2669_s24 = scalar_lea.vmem %s3025_s20, 1024  ;;  %p2674_p0 = scmp.lt.s32.totalorder %s3025_s20, %s3025_s20 }
  0x43   :  { %p2670_p13 = scmp.ne.s32.totalorder %s3025_s20, %s2669_s24  ;;  %p2675_p1 = scmp.lt.s32.totalorder %s2669_s24, %s2669_s24 }
  0x45   :  { %p2676_p2 = por %p2675_p1, %p2674_p0 }
  0x47   :  { %p2677_p3 = pnand %p2676_p2, %p2670_p13 }
  0x49   :  { %2680 = shalt.err (!%p2677_p3)
}
  0x4a   :  { %123 = dma.hbm_to_vmem [thread:$0]  %s3634_s7, 1024, %s3025_s20, [#allocation16], %s2897_s21, %s2897_s21, %s2898_s22  }
  0x4b   :  { %s2901_s25 = smov [#allocation18]   ;;  %s2681_s14 = scalar_lea.hbm %s3636_s9, 512 }
  0x4c   :  { %s141_s26 = sshll.u32 %s2901_s25, 4  ;;  %p2682_p4 = scmp.ne.s32.totalorder %s3636_s9, %s2681_s14  ;;  %s142_s26 = int_to_ptr.vmem [resolvable:$true] %s141_s26 }
  0x4d   :  { %p2685_p5 = scmp.lt.u32.totalorder %s2681_s14, %s3636_s9 }
  0x4f   :  { %p2687_p6 = pnand %p2685_p5, %p2682_p4 }
  0x51   :  { %2690 = shalt.err (!%p2687_p6)
}
  0x52   :  { %s2691_s16 = scalar_lea.vmem %s142_s26, 512  ;;  %p2696_p8 = scmp.lt.s32.totalorder %s142_s26, %s142_s26 }
  0x53   :  { %p2692_p7 = scmp.ne.s32.totalorder %s142_s26, %s2691_s16  ;;  %p2697_p9 = scmp.lt.s32.totalorder %s2691_s16, %s2691_s16 }
  0x55   :  { %p2698_p10 = por %p2697_p9, %p2696_p8 }
  0x57   :  { %p2699_p11 = pnand %p2698_p10, %p2692_p7 }
  0x59   :  { %2702 = shalt.err (!%p2699_p11)
}
  0x5a   :  { %s2902_s7 = smov 64   ;;  %s2903_s20 = smov 4  }
  0x5b   :  { %147 = dma.hbm_to_vmem [thread:$0]  %s3636_s9, 512, %s142_s26, [#allocation19], %s2902_s7, %s2902_s7, %s2903_s20  }
  0x5c   :  { %s2904_s17 = smov [#allocation3]   ;;  %s2905_s23 = smov [#allocation8]  }
  0x5d   :  { %s33_s19 = sshll.u32 %s2904_s17, 4  ;;  %s57_s24 = sshll.u32 %s2905_s23, 4  ;;  %s34_s19 = int_to_ptr.vmem [resolvable:$true] %s33_s19  ;;  %s58_s24 = int_to_ptr.vmem [resolvable:$true] %s57_s24 }
  0x5e   :  { %s2703_s25 = scalar_lea.hbm %s3627_s0, 384 }
  0x5f   :  { %p2704_p12 = scmp.ne.s32.totalorder %s3627_s0, %s2703_s25  ;;  %p2707_p13 = scmp.lt.u32.totalorder %s2703_s25, %s3627_s0 }
  0x61   :  { %p2709_p0 = pnand %p2707_p13, %p2704_p12 }
  0x63   :  { %2712 = shalt.err (!%p2709_p0)
}
  0x64   :  { %s2713_s9 = scalar_lea.vmem %s34_s19, 384  ;;  %p2718_p2 = scmp.lt.s32.totalorder %s34_s19, %s34_s19 }
  0x65   :  { %p2714_p1 = scmp.ne.s32.totalorder %s34_s19, %s2713_s9  ;;  %p2719_p3 = scmp.lt.s32.totalorder %s2713_s9, %s2713_s9 }
  0x67   :  { %p2720_p4 = por %p2719_p3, %p2718_p2 }
  0x69   :  { %p2721_p5 = pnand %p2720_p4, %p2714_p1 }
  0x6b   :  { %2724 = shalt.err (!%p2721_p5)
}
  0x6c   :  { %39 = dma.hbm_to_vmem [thread:$0]  %s3627_s0, 384, %s34_s19, [#allocation4], %s2897_s21, %s2897_s21, %s2898_s22  }
  0x6d   :  { %s2725_s16 = scalar_lea.hbm %s3629_s2, 4096 }
  0x6e   :  { %p2726_p6 = scmp.ne.s32.totalorder %s3629_s2, %s2725_s16  ;;  %p2729_p7 = scmp.lt.u32.totalorder %s2725_s16, %s3629_s2 }
  0x70   :  { %p2731_p8 = pnand %p2729_p7, %p2726_p6 }
  0x72   :  { %2734 = shalt.err (!%p2731_p8)
}
  0x73   :  { %s2735_s17 = scalar_lea.vmem %s58_s24, 4096  ;;  %p2740_p10 = scmp.lt.s32.totalorder %s58_s24, %s58_s24 }
  0x74   :  { %p2736_p9 = scmp.ne.s32.totalorder %s58_s24, %s2735_s17  ;;  %p2741_p11 = scmp.lt.s32.totalorder %s2735_s17, %s2735_s17 }
  0x76   :  { %p2742_p12 = por %p2741_p11, %p2740_p10 }
  0x78   :  { %p2743_p13 = pnand %p2742_p12, %p2736_p9 }
  0x7a   :  { %2746 = shalt.err (!%p2743_p13)
}
  0x7b   :  { %63 = dma.hbm_to_vmem [thread:$0]  %s3629_s2, 4096, %s58_s24, [#allocation7], %s2897_s21, %s2897_s21, %s2898_s22  }
  0x7c   :  { %s2906_s23 = smov [#allocation11]   ;;  %s2907_s18 = smov [#allocation14]  }
  0x7d   :  { %s81_s5 = sshll.u32 %s2906_s23, 4  ;;  %s105_s25 = sshll.u32 %s2907_s18, 4  ;;  %s82_s5 = int_to_ptr.vmem [resolvable:$true] %s81_s5  ;;  %s106_s25 = int_to_ptr.vmem [resolvable:$true] %s105_s25 }
  0x7e   :  { %s2747_s14 = scalar_lea.hbm %s3631_s4, 4096 }
  0x7f   :  { %p2748_p0 = scmp.ne.s32.totalorder %s3631_s4, %s2747_s14  ;;  %p2751_p1 = scmp.lt.u32.totalorder %s2747_s14, %s3631_s4 }
  0x81   :  { %p2753_p2 = pnand %p2751_p1, %p2748_p0 }
  0x83   :  { %2756 = shalt.err (!%p2753_p2)
}
  0x84   :  { %s2757_s2 = scalar_lea.vmem %s82_s5, 4096  ;;  %p2762_p4 = scmp.lt.s32.totalorder %s82_s5, %s82_s5 }
  0x85   :  { %p2758_p3 = scmp.ne.s32.totalorder %s82_s5, %s2757_s2  ;;  %p2763_p5 = scmp.lt.s32.totalorder %s2757_s2, %s2757_s2 }
  0x87   :  { %p2764_p6 = por %p2763_p5, %p2762_p4 }
  0x89   :  { %p2765_p7 = pnand %p2764_p6, %p2758_p3 }
  0x8b   :  { %2768 = shalt.err (!%p2765_p7)
}
  0x8c   :  { %87 = dma.hbm_to_vmem [thread:$0]  %s3631_s4, 4096, %s82_s5, [#allocation10], %s2897_s21, %s2897_s21, %s2898_s22  }
  0x8d   :  { %s2769_s7 = scalar_lea.hbm %s3633_s6, 4096 }
  0x8e   :  { %p2770_p8 = scmp.ne.s32.totalorder %s3633_s6, %s2769_s7  ;;  %p2773_p9 = scmp.lt.u32.totalorder %s2769_s7, %s3633_s6 }
  0x90   :  { %p2775_p10 = pnand %p2773_p9, %p2770_p8 }
  0x92   :  { %2778 = shalt.err (!%p2775_p10)
}
  0x93   :  { %s2779_s0 = scalar_lea.vmem %s106_s25, 4096  ;;  %p2784_p12 = scmp.lt.s32.totalorder %s106_s25, %s106_s25 }
  0x94   :  { %p2780_p11 = scmp.ne.s32.totalorder %s106_s25, %s2779_s0  ;;  %p2785_p13 = scmp.lt.s32.totalorder %s2779_s0, %s2779_s0 }
  0x96   :  { %p2786_p0 = por %p2785_p13, %p2784_p12 }
  0x98   :  { %p2787_p1 = pnand %p2786_p0, %p2780_p11 }
  0x9a   :  { %2790 = shalt.err (!%p2787_p1)
}
  0x9b   :  { %111 = dma.hbm_to_vmem [thread:$0]  %s3633_s6, 4096, %s106_s25, [#allocation13], %s2897_s21, %s2897_s21, %s2898_s22  }
  0x9c   :  { %s2908_s23 = smov [#allocation17]   ;;  %s2909_s18 = smov [#allocation20]  }
  0x9d   :  { %s129_s5 = sshll.u32 %s2908_s23, 4  ;;  %s153_s27 = sshll.u32 %s2909_s18, 4  ;;  %s130_s5 = int_to_ptr.vmem [resolvable:$true] %s129_s5  ;;  %s154_s27 = int_to_ptr.vmem [resolvable:$true] %s153_s27 }
  0x9e   :  { %s2791_s3 = scalar_lea.hbm %s3635_s8, 1024 }
  0x9f   :  { %p2792_p2 = scmp.ne.s32.totalorder %s3635_s8, %s2791_s3  ;;  %p2795_p3 = scmp.lt.u32.totalorder %s2791_s3, %s3635_s8 }
  0xa1   :  { %p2797_p4 = pnand %p2795_p3, %p2792_p2 }
  0xa3   :  { %2800 = shalt.err (!%p2797_p4)
}
  0xa4   :  { %s2801_s6 = scalar_lea.vmem %s130_s5, 1024  ;;  %p2806_p6 = scmp.lt.s32.totalorder %s130_s5, %s130_s5 }
  0xa5   :  { %p2802_p5 = scmp.ne.s32.totalorder %s130_s5, %s2801_s6  ;;  %p2807_p7 = scmp.lt.s32.totalorder %s2801_s6, %s2801_s6 }
  0xa7   :  { %p2808_p8 = por %p2807_p7, %p2806_p6 }
  0xa9   :  { %p2809_p9 = pnand %p2808_p8, %p2802_p5 }
  0xab   :  { %2812 = shalt.err (!%p2809_p9)
}
  0xac   :  { %135 = dma.hbm_to_vmem [thread:$0]  %s3635_s8, 1024, %s130_s5, [#allocation16], %s2897_s21, %s2897_s21, %s2898_s22  }
  0xad   :  { %s2813_s16 = scalar_lea.hbm %s3637_s10, 1024 }
  0xae   :  { %p2814_p10 = scmp.ne.s32.totalorder %s3637_s10, %s2813_s16  ;;  %p2817_p11 = scmp.lt.u32.totalorder %s2813_s16, %s3637_s10 }
  0xb0   :  { %p2819_p12 = pnand %p2817_p11, %p2814_p10 }
  0xb2   :  { %2822 = shalt.err (!%p2819_p12)
}
  0xb3   :  { %s2823_s17 = scalar_lea.vmem %s154_s27, 1024  ;;  %p2828_p0 = scmp.lt.s32.totalorder %s154_s27, %s154_s27 }
  0xb4   :  { %p2824_p13 = scmp.ne.s32.totalorder %s154_s27, %s2823_s17  ;;  %p2829_p1 = scmp.lt.s32.totalorder %s2823_s17, %s2823_s17 }
  0xb6   :  { %p2830_p2 = por %p2829_p1, %p2828_p0 }
  0xb8   :  { %p2831_p3 = pnand %p2830_p2, %p2824_p13 }
  0xba   :  { %2834 = shalt.err (!%p2831_p3)
}
  0xbb   :  { %159 = dma.hbm_to_vmem [thread:$0]  %s3637_s10, 1024, %s154_s27, [#allocation19], %s2897_s21, %s2897_s21, %s2898_s22  }
  0xbc   :  { %s2910_s4 = smov [#allocation21]   ;;  %s2835_s18 = scalar_lea.hbm %s3638_s11, 16 }
  0xbd   :  { %s166_s19 = sshll.u32 %s2910_s4, 4  ;;  %p2836_p4 = scmp.ne.s32.totalorder %s3638_s11, %s2835_s18  ;;  %s167_s19 = int_to_ptr.vmem [resolvable:$true] %s166_s19 }
  0xbe   :  { %p2839_p5 = scmp.lt.u32.totalorder %s2835_s18, %s3638_s11 }
  0xc0   :  { %p2841_p6 = pnand %p2839_p5, %p2836_p4 }
  0xc2   :  { %2844 = shalt.err (!%p2841_p6)
}
  0xc3   :  { %s2845_s26 = scalar_lea.vmem %s167_s19, 16  ;;  %s2849_s10 = scalar_lea.vmem %s167_s19, 32 }
  0xc4   :  { %p2846_p7 = scmp.ne.s32.totalorder %s167_s19, %s2845_s26  ;;  %p2850_p8 = scmp.lt.s32.totalorder %s167_s19, %s167_s19 }
  0xc5   :  { %p2851_p9 = scmp.lt.s32.totalorder %s2849_s10, %s2845_s26 }
  0xc7   :  { %p2852_p10 = por %p2851_p9, %p2850_p8 }
  0xc9   :  { %p2853_p11 = pnand %p2852_p10, %p2846_p7 }
  0xcb   :  { %2856 = shalt.err (!%p2853_p11)
}
  0xcc   :  { %169 = dma.hbm_to_vmem [thread:$0]  %s3638_s11, 16, %s167_s19, [#allocation22]  }
  0xcd   :  { %2879 = dma.done.wait [#allocation4], 384  }
  0xce   :  { %2880 = vsyncadd [#allocation4], 4294966912 }
  0xcf   :  { %2881 = dma.done.wait [#allocation7], 8192  }
  0xd0   :  { %2882 = vsyncadd [#allocation7], 4294959104 }
  0xd1   :  { %2883 = dma.done.wait [#allocation10], 8192  }
  0xd2   :  { %2884 = vsyncadd [#allocation10], 4294959104 }
  0xd3   :  { %2885 = dma.done.wait [#allocation13], 8192  }
  0xd4   :  { %2886 = vsyncadd [#allocation13], 4294959104 }
  0xd5   :  { %2887 = dma.done.wait [#allocation16], 2048  }
  0xd6   :  { %2888 = vsyncadd [#allocation16], 4294965248 }
  0xd7   :  { %2889 = dma.done.wait [#allocation19], 1536  }
  0xd8   :  { %2890 = vsyncadd [#allocation19], 4294965760 }
  0xd9   :  { %2891 = dma.done.wait [#allocation22], 16  }
  0xda   :  { %2892 = vsyncadd [#allocation22], 4294967280  ;;  %v2911_v1 = vmov 0   ;;  %v471_v2 = vld [vmem:[#allocation8 + $0x80] sm:$0xff]  ;;  %v472_v4 = vld [vmem:[#allocation8 + $0x88] sm:$0xff]  ;;  %vm215_vm0 = vcmask 1046528  }
  0xdb   :  { %2526 = vset.pattern.permute.xlu1 %v2911_v1  ;;  %2525 = vset.pattern.permute.xlu0 %v2911_v1  ;;  %v247_v3 = vld [vmem:[#allocation6 + $0x80] sm:$0xff]  ;;  %v248_v5 = vld [vmem:[#allocation6 + $0x88] sm:$0xff]  ;;  %v250_v14 = vld [vmem:[#allocation6 + $0x98] sm:$0xff]  ;;  %vm223_vm1 = vcmask 1045504   ;;  %vm2081_vm2 = vcmask 523264   ;;  %vm2913_vm3 = vmmov 0  }
  0xdc   :  { %569 = vperm.xlu1 %2526, %v471_v2   ;;  %345 = vperm.xlu0 %2525, %v247_v3   ;;  %v232_v6 = vld [vmem:[#allocation6 + $0x8] sm:$0xff]  ;;  %v231_v7 = vld [vmem:[#allocation6] sm:$0xff]  ;;  %v249_v15 = vld [vmem:[#allocation6 + $0x90] sm:$0xff]  ;;  %s2914_s11 = smov [#allocation23]  }
  0xdd   :  { %v456_v8 = vld [vmem:[#allocation8 + $0x8] sm:$0xff]  ;;  %v455_v9 = vld [vmem:[#allocation8] sm:$0xff]  ;;  %v474_v16 = vld [vmem:[#allocation8 + $0x98] sm:$0xff]  ;;  %s2232_s27 = sshll.u32 %s2914_s11, 4  ;;  %s2233_s27 = int_to_ptr.vmem [resolvable:$true] %s2232_s27 }
  0xde   :  { %v728_v10 = vld [vmem:[#allocation9 + $0x88] sm:$0xff]  ;;  %v727_v11 = vld [vmem:[#allocation9 + $0x80] sm:$0xff]  ;;  %v473_v17 = vld [vmem:[#allocation8 + $0x90] sm:$0xff]  ;;  %s2857_s30 = scalar_lea.vmem %s2233_s27, 16  ;;  %s2861_s2 = scalar_lea.vmem %s2233_s27, 32 }
  0xdf   :  { %v712_v12 = vld [vmem:[#allocation9 + $0x8] sm:$0xff]  ;;  %v711_v13 = vld [vmem:[#allocation9] sm:$0xff]  ;;  %v234_v18 = vld [vmem:[#allocation6 + $0x18] sm:$0xff]  ;;  %p2858_p12 = scmp.ne.s32.totalorder %s2233_s27, %s2857_s30  ;;  %p2862_p13 = scmp.lt.s32.totalorder %s2233_s27, %s2233_s27 }
  0xe0   :  { %574 = vperm.xlu1 %2526, %v472_v4   ;;  %350 = vperm.xlu0 %2525, %v248_v5   ;;  %v233_v19 = vld [vmem:[#allocation6 + $0x10] sm:$0xff]  ;;  %v458_v20 = vld [vmem:[#allocation8 + $0x18] sm:$0xff]  ;;  %v984_v24 = vld [vmem:[#allocation11 + $0x88] sm:$0xff]  ;;  %p2863_p0 = scmp.lt.s32.totalorder %s2861_s2, %s2857_s30 }
  0xe1   :  { %v457_v21 = vld [vmem:[#allocation8 + $0x10] sm:$0xff]  ;;  %v730_v22 = vld [vmem:[#allocation9 + $0x98] sm:$0xff]  ;;  %v983_v25 = vld [vmem:[#allocation11 + $0x80] sm:$0xff] }
  0xe2   :  { %v729_v23 = vld [vmem:[#allocation9 + $0x90] sm:$0xff]  ;;  %v714_v26 = vld [vmem:[#allocation9 + $0x18] sm:$0xff]  ;;  %v968_v28 = vld [vmem:[#allocation11 + $0x8] sm:$0xff]  ;;  %p2864_p1 = por %p2863_p0, %p2862_p13 }
  0xe3   :  { %v713_v27 = vld [vmem:[#allocation9 + $0x10] sm:$0xff]  ;;  %v967_v29 = vld [vmem:[#allocation11] sm:$0xff]  ;;  %v252_v30 = vld [vmem:[#allocation6 + $0xa8] sm:$0xff] }
  0xe4   :  { %270 = vperm.xlu1 %2526, %v232_v6   ;;  %265 = vperm.xlu0 %2525, %v231_v7   ;;  %v251_v31 = vld [vmem:[#allocation6 + $0xa0] sm:$0xff]  ;;  %v476_v32 = vld [vmem:[#allocation8 + $0xa8] sm:$0xff]  ;;  %v986_v40 = vld [vmem:[#allocation11 + $0x98] sm:$0xff]  ;;  %p2865_p2 = pnand %p2864_p1, %p2858_p12 }
  0xe5   :  { %v475_v33 = vld [vmem:[#allocation8 + $0xa0] sm:$0xff]  ;;  %v236_v34 = vld [vmem:[#allocation6 + $0x28] sm:$0xff]  ;;  %v985_v41 = vld [vmem:[#allocation11 + $0x90] sm:$0xff] }
  0xe6   :  { %v235_v35 = vld [vmem:[#allocation6 + $0x20] sm:$0xff]  ;;  %v460_v36 = vld [vmem:[#allocation8 + $0x28] sm:$0xff]  ;;  %v970_v44 = vld [vmem:[#allocation11 + $0x18] sm:$0xff] }
  0xe7   :  { %v459_v37 = vld [vmem:[#allocation8 + $0x20] sm:$0xff]  ;;  %v732_v38 = vld [vmem:[#allocation9 + $0xa8] sm:$0xff]  ;;  %v969_v45 = vld [vmem:[#allocation11 + $0x10] sm:$0xff] }
  0xe8   :  { %494 = vperm.xlu1 %2526, %v456_v8   ;;  %489 = vperm.xlu0 %2525, %v455_v9   ;;  %v731_v39 = vld [vmem:[#allocation9 + $0xa0] sm:$0xff]  ;;  %v716_v42 = vld [vmem:[#allocation9 + $0x28] sm:$0xff]  ;;  %v254_v46 = vld [vmem:[#allocation6 + $0xb8] sm:$0xff] }
  0xe9   :  { %v715_v43 = vld [vmem:[#allocation9 + $0x20] sm:$0xff]  ;;  %v253_v47 = vld [vmem:[#allocation6 + $0xb0] sm:$0xff]  ;;  %v478_v48 = vld [vmem:[#allocation8 + $0xb8] sm:$0xff] }
  0xea   :  { %v477_v49 = vld [vmem:[#allocation8 + $0xb0] sm:$0xff]  ;;  %v238_v50 = vld [vmem:[#allocation6 + $0x38] sm:$0xff]  ;;  %v988_v56 = vld [vmem:[#allocation11 + $0xa8] sm:$0xff] }
  0xeb   :  { %v237_v51 = vld [vmem:[#allocation6 + $0x30] sm:$0xff]  ;;  %v462_v52 = vld [vmem:[#allocation8 + $0x38] sm:$0xff]  ;;  %v987_v57 = vld [vmem:[#allocation11 + $0xa0] sm:$0xff] }
  0xec   :  { %830 = vperm.xlu1 %2526, %v728_v10   ;;  %825 = vperm.xlu0 %2525, %v727_v11   ;;  %v461_v53 = vld [vmem:[#allocation8 + $0x30] sm:$0xff]  ;;  %v734_v54 = vld [vmem:[#allocation9 + $0xb8] sm:$0xff]  ;;  %v972_v60 = vld [vmem:[#allocation11 + $0x28] sm:$0xff] }
  0xed   :  { %v733_v55 = vld [vmem:[#allocation9 + $0xb0] sm:$0xff]  ;;  %v718_v58 = vld [vmem:[#allocation9 + $0x38] sm:$0xff]  ;;  %v971_v61 = vld [vmem:[#allocation11 + $0x20] sm:$0xff] }
  0xee   :  { %v717_v59 = vld [vmem:[#allocation9 + $0x30] sm:$0xff]  ;;  %v256_v62 = vld [vmem:[#allocation6 + $0xc8] sm:$0xff]  ;;  %v255_v63 = vld [vmem:[#allocation6 + $0xc0] sm:$0xff] }
  0xef   :  { %v480_v0 = vld [vmem:[#allocation8 + $0xc8] sm:$0xff]  ;;  %v479_v1 = vld [vmem:[#allocation8 + $0xc0] sm:$0xff] }
  0xf0   :  { %750 = vperm.xlu1 %2526, %v712_v12   ;;  %745 = vperm.xlu0 %2525, %v711_v13   ;;  %v240_v2 = vld [vmem:[#allocation6 + $0x48] sm:$0xff]  ;;  %v239_v3 = vld [vmem:[#allocation6 + $0x40] sm:$0xff] }
  0xf1   :  { %v464_v6 = vld [vmem:[#allocation8 + $0x48] sm:$0xff]  ;;  %v463_v7 = vld [vmem:[#allocation8 + $0x40] sm:$0xff] }
  0xf2   :  { %v736_v10 = vld [vmem:[#allocation9 + $0xc8] sm:$0xff]  ;;  %v735_v11 = vld [vmem:[#allocation9 + $0xc0] sm:$0xff] }
  0xf4   :  { %360 = vperm.xlu1 %2526, %v250_v14   ;;  %355 = vperm.xlu0 %2525, %v249_v15   ;;  %v990_v14 = vld [vmem:[#allocation11 + $0xb8] sm:$0xff]  ;;  %v989_v15 = vld [vmem:[#allocation11 + $0xb0] sm:$0xff] }
  0xf8   :  { %584 = vperm.xlu1 %2526, %v474_v16   ;;  %579 = vperm.xlu0 %2525, %v473_v17  }
  0xfc   :  { %280 = vperm.xlu1 %2526, %v234_v18   ;;  %275 = vperm.xlu0 %2525, %v233_v19   ;;  %v720_v18 = vld [vmem:[#allocation9 + $0x48] sm:$0xff]  ;;  %v719_v19 = vld [vmem:[#allocation9 + $0x40] sm:$0xff] }
 0x100   :  { %504 = vperm.xlu1 %2526, %v458_v20   ;;  %499 = vperm.xlu0 %2525, %v457_v21  }
 0x104   :  { %840 = vperm.xlu1 %2526, %v730_v22   ;;  %835 = vperm.xlu0 %2525, %v729_v23   ;;  %v974_v22 = vld [vmem:[#allocation11 + $0x38] sm:$0xff]  ;;  %v973_v23 = vld [vmem:[#allocation11 + $0x30] sm:$0xff] }
 0x108   :  { %1086 = vperm.xlu1 %2526, %v984_v24   ;;  %1081 = vperm.xlu0 %2525, %v983_v25  }
 0x10c   :  { %760 = vperm.xlu1 %2526, %v714_v26   ;;  %755 = vperm.xlu0 %2525, %v713_v27   ;;  %v258_v26 = vld [vmem:[#allocation6 + $0xd8] sm:$0xff]  ;;  %v257_v27 = vld [vmem:[#allocation6 + $0xd0] sm:$0xff] }
 0x110   :  { %1006 = vperm.xlu1 %2526, %v968_v28   ;;  %1001 = vperm.xlu0 %2525, %v967_v29  }
 0x114   :  { %370 = vperm.xlu1 %2526, %v252_v30   ;;  %365 = vperm.xlu0 %2525, %v251_v31   ;;  %v3200_v30 = vld [vmem:[#allocation3] sm:$0xff]  ;;  %v3202_v31 = vld [vmem:[#allocation3 + $0x8] sm:$0xff] }
 0x118   :  { %594 = vperm.xlu1 %2526, %v476_v32   ;;  %589 = vperm.xlu0 %2525, %v475_v33   ;;  %v482_v32 = vld [vmem:[#allocation8 + $0xd8] sm:$0xff]  ;;  %v481_v33 = vld [vmem:[#allocation8 + $0xd0] sm:$0xff] }
 0x11c   :  { %290 = vperm.xlu1 %2526, %v236_v34   ;;  %285 = vperm.xlu0 %2525, %v235_v35   ;;  %v211_v34 = vld [vmem:[#allocation3 + $0x10] sm:$0x3] }
 0x120   :  { %514 = vperm.xlu1 %2526, %v460_v36   ;;  %509 = vperm.xlu0 %2525, %v459_v37   ;;  %v216_v37 = vrot.slane %v3200_v30, 1 }
 0x124   :  { %850 = vperm.xlu1 %2526, %v732_v38   ;;  %845 = vperm.xlu0 %2525, %v731_v39   ;;  %v217_v38 = vrot.slane %v3202_v31, 1  ;;  %v219_v39 = vrot.slane %v211_v34, 1 }
 0x128   :  { %1096 = vperm.xlu1 %2526, %v986_v40   ;;  %1091 = vperm.xlu0 %2525, %v985_v41   ;;  %v242_v40 = vld [vmem:[#allocation6 + $0x58] sm:$0xff]  ;;  %v241_v41 = vld [vmem:[#allocation6 + $0x50] sm:$0xff] }
 0x12c   :  { %770 = vperm.xlu1 %2526, %v716_v42   ;;  %765 = vperm.xlu0 %2525, %v715_v43   ;;  %v225_v42 = vrot.slane %v3202_v31, 2  ;;  %v227_v43 = vrot.slane %v211_v34, 2 }
 0x130   :  { %1016 = vperm.xlu1 %2526, %v970_v44   ;;  %1011 = vperm.xlu0 %2525, %v969_v45   ;;  %v224_v44 = vrot.slane %v3200_v30, 2 }
 0x134   :  { %380 = vperm.xlu1 %2526, %v254_v46   ;;  %375 = vperm.xlu0 %2525, %v253_v47   ;;  %v3216_v47 = vsel %vm215_vm0, %v216_v37, %v217_v38 }
 0x138   :  { %604 = vperm.xlu1 %2526, %v478_v48   ;;  %599 = vperm.xlu0 %2525, %v477_v49   ;;  %v3218_v48 = vsel %vm215_vm0, %v217_v38, %v219_v39  ;;  %v466_v49 = vld [vmem:[#allocation8 + $0x58] sm:$0xff] }
 0x13c   :  { %300 = vperm.xlu1 %2526, %v238_v50   ;;  %295 = vperm.xlu0 %2525, %v237_v51   ;;  %v465_v50 = vld [vmem:[#allocation8 + $0x50] sm:$0xff] }
 0x140   :  { %524 = vperm.xlu1 %2526, %v462_v52   ;;  %519 = vperm.xlu0 %2525, %v461_v53   ;;  %v3222_v52 = vsel %vm223_vm1, %v225_v42, %v227_v43  ;;  %v3224_v53 = vsel %vm223_vm1, %v224_v44, %v225_v42 }
 0x144   :  { %860 = vperm.xlu1 %2526, %v734_v54   ;;  %855 = vperm.xlu0 %2525, %v733_v55  }
 0x148   :  { %1106 = vperm.xlu1 %2526, %v988_v56   ;;  %1101 = vperm.xlu0 %2525, %v987_v57  }
 0x14c   :  { %780 = vperm.xlu1 %2526, %v718_v58   ;;  %775 = vperm.xlu0 %2525, %v717_v59   ;;  %v738_v59 = vld [vmem:[#allocation9 + $0xd8] sm:$0xff] }
 0x150   :  { %1026 = vperm.xlu1 %2526, %v972_v60   ;;  %1021 = vperm.xlu0 %2525, %v971_v61   ;;  %v737_v60 = vld [vmem:[#allocation9 + $0xd0] sm:$0xff] }
 0x154   :  { %390 = vperm.xlu1 %2526, %v256_v62   ;;  %385 = vperm.xlu0 %2525, %v255_v63  }
 0x158   :  { %614 = vperm.xlu1 %2526, %v480_v0   ;;  %609 = vperm.xlu0 %2525, %v479_v1  }
 0x15b   :  { %v3176_v4 = vpop.permute.xlu1 %569  ;;  %v3178_v5 = vpop.permute.xlu0 %345 }
 0x15c   :  { %310 = vperm.xlu1 %2526, %v240_v2   ;;  %305 = vperm.xlu0 %2525, %v239_v3   ;;  %v663_v51 = vmul.f32 %v3176_v4, %v3216_v47  ;;  %v439_v56 = vmul.f32 %v3178_v5, %v3200_v30  ;;  %v992_v3 = vld [vmem:[#allocation11 + $0xc8] sm:$0xff]  ;;  %v991_v4 = vld [vmem:[#allocation11 + $0xc0] sm:$0xff] }
 0x15e   :  { %v695_v1 = vadd.f32 %v663_v51, %v439_v56  ;;  %v484_v51 = vld [vmem:[#allocation8 + $0xe8] sm:$0xff]  ;;  %v483_v56 = vld [vmem:[#allocation8 + $0xe0] sm:$0xff] }
 0x15f   :  { %v3180_v8 = vpop.permute.xlu1 %574  ;;  %v3182_v9 = vpop.permute.xlu0 %350 }
 0x160   :  { %534 = vperm.xlu1 %2526, %v464_v6   ;;  %529 = vperm.xlu0 %2525, %v463_v7   ;;  %v664_v57 = vmul.f32 %v3180_v8, %v3218_v48  ;;  %v440_v58 = vmul.f32 %v3182_v9, %v3202_v31 }
 0x162   :  { %v696_v2 = vadd.f32 %v664_v57, %v440_v58 }
 0x163   :  { %v3184_v12 = vpop.permute.xlu1 %270  ;;  %v3186_v13 = vpop.permute.xlu0 %265 }
 0x164   :  { %870 = vperm.xlu1 %2526, %v736_v10   ;;  %865 = vperm.xlu0 %2525, %v735_v11  }
 0x167   :  { %v3188_v16 = vpop.permute.xlu1 %494  ;;  %v3190_v17 = vpop.permute.xlu0 %489 }
 0x168   :  { %1116 = vperm.xlu1 %2526, %v990_v14   ;;  %1111 = vperm.xlu0 %2525, %v989_v15   ;;  %v648_v7 = vmul.f32 %v3188_v16, %v3218_v48  ;;  %v647_v10 = vmul.f32 %v3190_v17, %v3216_v47  ;;  %v424_v15 = vmul.f32 %v3184_v12, %v3202_v31 }
 0x16b   :  { %v831_v20 = vpop.permute.xlu1 %830  ;;  %v826_v21 = vpop.permute.xlu0 %825 }
 0x16c   :  { %790 = vperm.xlu1 %2526, %v720_v18   ;;  %785 = vperm.xlu0 %2525, %v719_v19   ;;  %v920_v61 = vmul.f32 %v831_v20, %v3222_v52  ;;  %v919_v62 = vmul.f32 %v826_v21, %v3224_v53  ;;  %v423_v18 = vmul.f32 %v3186_v13, %v3200_v30  ;;  %v722_v19 = vld [vmem:[#allocation9 + $0x58] sm:$0xff]  ;;  %v721_v20 = vld [vmem:[#allocation9 + $0x50] sm:$0xff]  ;;  %v976_v13 = vld [vmem:[#allocation11 + $0x48] sm:$0xff] }
 0x16e   :  { %v952_v5 = vadd.f32 %v920_v61, %v696_v2  ;;  %v951_v6 = vadd.f32 %v919_v62, %v695_v1  ;;  %v468_v1 = vld [vmem:[#allocation8 + $0x68] sm:$0xff]  ;;  %v467_v2 = vld [vmem:[#allocation8 + $0x60] sm:$0xff] }
 0x16f   :  { %v3192_v24 = vpop.permute.xlu1 %750  ;;  %v3194_v25 = vpop.permute.xlu0 %745 }
 0x170   :  { %1036 = vperm.xlu1 %2526, %v974_v22   ;;  %1031 = vperm.xlu0 %2525, %v973_v23   ;;  %v904_v16 = vmul.f32 %v3192_v24, %v3222_v52  ;;  %v903_v21 = vmul.f32 %v3194_v25, %v3224_v53 }
 0x173   :  { %v3196_v28 = vpop.permute.xlu1 %360  ;;  %v3198_v29 = vpop.permute.xlu0 %355 }
 0x174   :  { %400 = vperm.xlu1 %2526, %v258_v26   ;;  %395 = vperm.xlu0 %2525, %v257_v27   ;;  %v680_v27 = vadd.f32 %v648_v7, %v424_v15  ;;  %v740_v7 = vld [vmem:[#allocation9 + $0xe8] sm:$0xff] }
 0x176   :  { %v936_v34 = vadd.f32 %v904_v16, %v680_v27 }
 0x177   :  { %v3204_v35 = vpop.permute.xlu1 %584  ;;  %v3206_v36 = vpop.permute.xlu0 %579 }
 0x178   :  { %624 = vperm.xlu1 %2526, %v482_v32   ;;  %619 = vperm.xlu0 %2525, %v481_v33   ;;  %v679_v32 = vadd.f32 %v647_v10, %v423_v18  ;;  %v975_v33 = vld [vmem:[#allocation11 + $0x40] sm:$0xff]  ;;  %v441_v10 = vmul.f32 %v3198_v29, %v3200_v30 }
 0x17a   :  { %v935_v24 = vadd.f32 %v903_v21, %v679_v32 }
 0x17b   :  { %v3212_v45 = vpop.permute.xlu1 %280  ;;  %v3214_v46 = vpop.permute.xlu0 %275 }
 0x17c   :  { %320 = vperm.xlu1 %2526, %v242_v40   ;;  %315 = vperm.xlu0 %2525, %v241_v41   ;;  %v260_v40 = vld [vmem:[#allocation6 + $0xe8] sm:$0xff]  ;;  %v259_v41 = vld [vmem:[#allocation6 + $0xe0] sm:$0xff]  ;;  %v426_v27 = vmul.f32 %v3212_v45, %v3202_v31  ;;  %v425_v32 = vmul.f32 %v3214_v46, %v3200_v30  ;;  %v978_v46 = vld [vmem:[#allocation11 + $0x58] sm:$0xff] }
 0x17f   :  { %v3226_v54 = vpop.permute.xlu1 %504  ;;  %v3228_v55 = vpop.permute.xlu0 %499 }
 0x180   :  { %544 = vperm.xlu1 %2526, %v466_v49   ;;  %539 = vperm.xlu0 %2525, %v465_v50   ;;  %v650_v29 = vmul.f32 %v3226_v54, %v3218_v48 }
 0x183   :  { %v3238_v63 = vpop.permute.xlu1 %840  ;;  %v3240_v0 = vpop.permute.xlu0 %835 }
 0x184   :  { %880 = vperm.xlu1 %2526, %v738_v59   ;;  %875 = vperm.xlu0 %2525, %v737_v60   ;;  %v244_v59 = vld [vmem:[#allocation6 + $0x68] sm:$0xff]  ;;  %v243_v60 = vld [vmem:[#allocation6 + $0x60] sm:$0xff] }
 0x187   :  { %v1087_v8 = vpop.permute.xlu1 %1086  ;;  %v1082_v9 = vpop.permute.xlu0 %1081 }
 0x188   :  { %v1176_v11 = vadd.f32 %v1087_v8, %v952_v5  ;;  %v1175_v14 = vadd.f32 %v1082_v9, %v951_v6  ;;  %1126 = vperm.xlu1 %2526, %v992_v3   ;;  %1121 = vperm.xlu0 %2525, %v991_v4   ;;  %v666_v5 = vmul.f32 %v3204_v35, %v3218_v48  ;;  %v739_v8 = vld [vmem:[#allocation9 + $0xe0] sm:$0xff] }
 0x189   :  { %v665_v6 = vmul.f32 %v3206_v36, %v3216_v47  ;;  %v442_v9 = vmul.f32 %v3196_v28, %v3202_v31 }
 0x18a   :  { %v1208_v22 = vmax.f32 %v1176_v11, 0.0  ;;  %v1207_v17 = vmax.f32 %v1175_v14, 0.0  ;;  %v922_v11 = vmul.f32 %v3238_v63, %v3222_v52  ;;  %v921_v14 = vmul.f32 %v3240_v0, %v3224_v53 }
 0x18b   :  { %v3254_v23 = vpop.permute.xlu1 %760  ;;  %v3256_v26 = vpop.permute.xlu0 %755  ;;  %v698_v36 = vadd.f32 %v666_v5, %v442_v9  ;;  %v697_v18 = vadd.f32 %v665_v6, %v441_v10  ;;  %v649_v0 = vmul.f32 %v3228_v55, %v3216_v47  ;;  %v486_v5 = vld [vmem:[#allocation8 + $0xf8] sm:$0xff]  ;;  %v485_v6 = vld [vmem:[#allocation8 + $0xf0] sm:$0xff] }
 0x18c   :  { %800 = vperm.xlu1 %2526, %v722_v19   ;;  %795 = vperm.xlu0 %2525, %v721_v20   ;;  %v1231_v12 = vpack.c.bf16 %v1208_v22, %v1207_v17  ;;  %v994_v19 = vld [vmem:[#allocation11 + $0xd8] sm:$0xff]  ;;  %v993_v20 = vld [vmem:[#allocation11 + $0xd0] sm:$0xff]  ;;  %v906_v54 = vmul.f32 %v3254_v23, %v3222_v52 }
 0x18d   :  { %v954_v28 = vadd.f32 %v922_v11, %v698_v36  ;;  %v953_v16 = vadd.f32 %v921_v14, %v697_v18  ;;  %v246_v9 = vld [vmem:[#allocation6 + $0x78] sm:$0xff]  ;;  %v245_v10 = vld [vmem:[#allocation6 + $0x70] sm:$0xff] }
 0x18e   :  { %2296 = vmatprep.subr.bf16.mxu0 %v1231_v12  ;;  %2489 = vmatprep.subr.bf16.mxu1 %v1231_v12  ;;  %v724_v12 = vld [vmem:[#allocation9 + $0x68] sm:$0xff]  ;;  %v470_v36 = vld [vmem:[#allocation8 + $0x78] sm:$0xff]  ;;  %v469_v18 = vld [vmem:[#allocation8 + $0x70] sm:$0xff] }
 0x18f   :  { %v1007_v37 = vpop.permute.xlu1 %1006  ;;  %v1002_v38 = vpop.permute.xlu0 %1001 }
 0x190   :  { %v1160_v25 = vadd.f32 %v1007_v37, %v936_v34  ;;  %v1159_v39 = vadd.f32 %v1002_v38, %v935_v24  ;;  %1046 = vperm.xlu1 %2526, %v976_v13   ;;  %1041 = vperm.xlu0 %2525, %v975_v33   ;;  %v723_v13 = vld [vmem:[#allocation9 + $0x60] sm:$0xff]  ;;  %v905_v33 = vmul.f32 %v3256_v26, %v3224_v53 }
 0x191   :  { %v682_v38 = vadd.f32 %v650_v29, %v426_v27  ;;  %v742_v29 = vld [vmem:[#allocation9 + $0xf8] sm:$0xff] }
 0x192   :  { %v1192_v42 = vmax.f32 %v1160_v25, 0.0  ;;  %v1191_v43 = vmax.f32 %v1159_v39, 0.0  ;;  %v681_v25 = vadd.f32 %v649_v0, %v425_v32  ;;  %v977_v39 = vld [vmem:[#allocation11 + $0x50] sm:$0xff] }
 0x193   :  { %v3258_v44 = vpop.permute.xlu1 %370  ;;  %v3260_v49 = vpop.permute.xlu0 %365 }
 0x194   :  { %410 = vperm.xlu1 %2526, %v260_v40   ;;  %405 = vperm.xlu0 %2525, %v259_v41   ;;  %v1223_v50 = vpack.c.bf16 %v1192_v42, %v1191_v43  ;;  %v938_v40 = vadd.f32 %v906_v54, %v682_v38  ;;  %v937_v23 = vadd.f32 %v905_v33, %v681_v25 }
 0x195   :  { %v443_v0 = vmul.f32 %v3260_v49, %v3200_v30 }
 0x196   :  { %2297 = vmatpush3.bf16.msra.mxu0 %v1223_v50  ;;  %2497 = vmatpush3.bf16.msra.mxu1 %v1223_v50  ;;  %v262_v50 = vld [vmem:[#allocation6 + $0xf8] sm:$0xff] }
 0x197   :  { %v3262_v57 = vpop.permute.xlu1 %594  ;;  %v3264_v58 = vpop.permute.xlu0 %589 }
 0x198   :  { %634 = vperm.xlu1 %2526, %v484_v51   ;;  %629 = vperm.xlu0 %2525, %v483_v56   ;;  %v261_v51 = vld [vmem:[#allocation6 + $0xf0] sm:$0xff] }
 0x19b   :  { %v3266_v61 = vpop.permute.xlu1 %290  ;;  %v3268_v62 = vpop.permute.xlu0 %285 }
 0x19c   :  { %330 = vperm.xlu1 %2526, %v244_v59   ;;  %325 = vperm.xlu0 %2525, %v243_v60   ;;  %v428_v38 = vmul.f32 %v3266_v61, %v3202_v31  ;;  %v427_v25 = vmul.f32 %v3268_v62, %v3200_v30  ;;  %v980_v62 = vld [vmem:[#allocation11 + $0x68] sm:$0xff] }
 0x19f   :  { %v3270_v3 = vpop.permute.xlu1 %514  ;;  %v3272_v4 = vpop.permute.xlu0 %509 }
 0x1a0   :  { %554 = vperm.xlu1 %2526, %v468_v1   ;;  %549 = vperm.xlu0 %2525, %v467_v2   ;;  %v652_v49 = vmul.f32 %v3270_v3, %v3218_v48 }
 0x1a3   :  { %v3286_v35 = vpop.permute.xlu1 %850  ;;  %v3288_v15 = vpop.permute.xlu0 %845 }
 0x1a4   :  { %890 = vperm.xlu1 %2526, %v740_v7   ;;  %885 = vperm.xlu0 %2525, %v739_v8  }
 0x1a7   :  { %v1097_v21 = vpop.permute.xlu1 %1096  ;;  %v1092_v63 = vpop.permute.xlu0 %1091 }
 0x1a8   :  { %v1178_v22 = vadd.f32 %v1097_v21, %v954_v28  ;;  %v1177_v17 = vadd.f32 %v1092_v63, %v953_v16  ;;  %1136 = vperm.xlu1 %2526, %v994_v19   ;;  %1131 = vperm.xlu0 %2525, %v993_v20   ;;  %v668_v28 = vmul.f32 %v3262_v57, %v3218_v48  ;;  %v741_v21 = vld [vmem:[#allocation9 + $0xf0] sm:$0xff] }
 0x1a9   :  { %v667_v16 = vmul.f32 %v3264_v58, %v3216_v47  ;;  %v444_v63 = vmul.f32 %v3258_v44, %v3202_v31 }
 0x1aa   :  { %v1210_v34 = vmax.f32 %v1178_v22, 0.0  ;;  %v1209_v55 = vmax.f32 %v1177_v17, 0.0  ;;  %v924_v22 = vmul.f32 %v3286_v35, %v3222_v52  ;;  %v923_v17 = vmul.f32 %v3288_v15, %v3224_v53 }
 0x1ab   :  { %v3302_v24 = vpop.permute.xlu1 %770  ;;  %v3304_v37 = vpop.permute.xlu0 %765  ;;  %v700_v58 = vadd.f32 %v668_v28, %v444_v63  ;;  %v699_v32 = vadd.f32 %v667_v16, %v443_v0  ;;  %v651_v15 = vmul.f32 %v3272_v4, %v3216_v47  ;;  %v982_v28 = vld [vmem:[#allocation11 + $0x78] sm:$0xff]  ;;  %v981_v16 = vld [vmem:[#allocation11 + $0x70] sm:$0xff]  ;;  %v1288_v63 = vld [vmem:[#allocation14 + $0x88] sm:$0xff] }
 0x1ac   :  { %810 = vperm.xlu1 %2526, %v724_v12   ;;  %805 = vperm.xlu0 %2525, %v723_v13   ;;  %v1232_v45 = vpack.c.bf16 %v1210_v34, %v1209_v55  ;;  %v996_v12 = vld [vmem:[#allocation11 + $0xe8] sm:$0xff]  ;;  %v995_v13 = vld [vmem:[#allocation11 + $0xe0] sm:$0xff]  ;;  %v908_v3 = vmul.f32 %v3302_v24, %v3222_v52 }
 0x1ad   :  { %v956_v44 = vadd.f32 %v924_v22, %v700_v58  ;;  %v955_v54 = vadd.f32 %v923_v17, %v699_v32  ;;  %v1287_v0 = vld [vmem:[#allocation14 + $0x80] sm:$0xff]  ;;  %v1272_v58 = vld [vmem:[#allocation14 + $0x8] sm:$0xff] }
 0x1ae   :  { %2298 = vmatprep.subr.bf16.mxu0 %v1232_v45  ;;  %2490 = vmatprep.subr.bf16.mxu1 %v1232_v45  ;;  %v726_v45 = vld [vmem:[#allocation9 + $0x78] sm:$0xff]  ;;  %v1271_v32 = vld [vmem:[#allocation14] sm:$0xff] }
 0x1af   :  { %v1017_v41 = vpop.permute.xlu1 %1016  ;;  %v1012_v42 = vpop.permute.xlu0 %1011 }
 0x1b0   :  { %v1162_v26 = vadd.f32 %v1017_v41, %v938_v40  ;;  %v1161_v43 = vadd.f32 %v1012_v42, %v937_v23  ;;  %1056 = vperm.xlu1 %2526, %v978_v46   ;;  %1051 = vperm.xlu0 %2525, %v977_v39   ;;  %v725_v46 = vld [vmem:[#allocation9 + $0x70] sm:$0xff]  ;;  %v907_v39 = vmul.f32 %v3304_v37, %v3224_v53 }
 0x1b1   :  { %v684_v42 = vadd.f32 %v652_v49, %v428_v38 }
 0x1b2   :  { %v1194_v56 = vmax.f32 %v1162_v26, 0.0  ;;  %v1193_v59 = vmax.f32 %v1161_v43, 0.0  ;;  %v683_v26 = vadd.f32 %v651_v15, %v427_v25  ;;  %v979_v43 = vld [vmem:[#allocation11 + $0x60] sm:$0xff]  ;;  %v1289_v15 = vld [vmem:[#allocation14 + $0x90] sm:$0xff] }
 0x1b3   :  { %v3306_v60 = vpop.permute.xlu1 %380  ;;  %v3308_v1 = vpop.permute.xlu0 %375 }
 0x1b4   :  { %420 = vperm.xlu1 %2526, %v262_v50   ;;  %415 = vperm.xlu0 %2525, %v261_v51   ;;  %v1224_v2 = vpack.c.bf16 %v1194_v56, %v1193_v59  ;;  %v940_v50 = vadd.f32 %v908_v3, %v684_v42  ;;  %v939_v24 = vadd.f32 %v907_v39, %v683_v26  ;;  %v1274_v3 = vld [vmem:[#allocation14 + $0x18] sm:$0xff]  ;;  %v1273_v39 = vld [vmem:[#allocation14 + $0x10] sm:$0xff] }
 0x1b6   :  { %2299 = vmatpush3.bf16.msra.mxu0 %v1224_v2  ;;  %2498 = vmatpush3.bf16.msra.mxu1 %v1224_v2  ;;  %v998_v2 = vld [vmem:[#allocation11 + $0xf8] sm:$0xff] }
 0x1b7   :  { %v3310_v7 = vpop.permute.xlu1 %604  ;;  %v3312_v8 = vpop.permute.xlu0 %599 }
 0x1b8   :  { %644 = vperm.xlu1 %2526, %v486_v5   ;;  %639 = vperm.xlu0 %2525, %v485_v6   ;;  %v997_v5 = vld [vmem:[#allocation11 + $0xf0] sm:$0xff]  ;;  %v670_v49 = vmul.f32 %v3310_v7, %v3218_v48 }
 0x1bb   :  { %v3314_v11 = vpop.permute.xlu1 %300  ;;  %v3316_v14 = vpop.permute.xlu0 %295 }
 0x1bc   :  { %340 = vperm.xlu1 %2526, %v246_v9   ;;  %335 = vperm.xlu0 %2525, %v245_v10  }
 0x1bf   :  { %v3318_v19 = vpop.permute.xlu1 %524  ;;  %v3320_v20 = vpop.permute.xlu0 %519 }
 0x1c0   :  { %564 = vperm.xlu1 %2526, %v470_v36   ;;  %559 = vperm.xlu0 %2525, %v469_v18  }
 0x1c3   :  { %v3334_v57 = vpop.permute.xlu1 %860  ;;  %v3336_v27 = vpop.permute.xlu0 %855 }
 0x1c4   :  { %900 = vperm.xlu1 %2526, %v742_v29   ;;  %895 = vperm.xlu0 %2525, %v741_v21   ;;  %v926_v38 = vmul.f32 %v3334_v57, %v3222_v52  ;;  %v925_v7 = vmul.f32 %v3336_v27, %v3224_v53  ;;  %v653_v27 = vmul.f32 %v3320_v20, %v3216_v47 }
 0x1c7   :  { %v1107_v33 = vpop.permute.xlu1 %1106  ;;  %v1102_v35 = vpop.permute.xlu0 %1101 }
 0x1c8   :  { %v1180_v34 = vadd.f32 %v1107_v33, %v956_v44  ;;  %v1179_v55 = vadd.f32 %v1102_v35, %v955_v54  ;;  %1146 = vperm.xlu1 %2526, %v996_v12   ;;  %1141 = vperm.xlu0 %2525, %v995_v13   ;;  %v2529_v12 = vld [vmem:[#allocation12 + $0x4] ss:$8 sps:$4 sm:$0xff]   ;;  %v669_v33 = vmul.f32 %v3312_v8, %v3216_v47  ;;  %v1290_v35 = vld [vmem:[#allocation14 + $0x98] sm:$0xff] }
 0x1c9   :  { %v2532_v13 = vld [vmem:[#allocation12 + $0xc4] ss:$8 sps:$4 sm:$0xff]   ;;  %1655 = vmatprep.mubr.bf16.mxu0 %v2529_v12 }
 0x1ca   :  { %v1212_v40 = vmax.f32 %v1180_v34, 0.0  ;;  %v1211_v4 = vmax.f32 %v1179_v55, 0.0  ;;  %1751 = vmatprep.mubr.bf16.mxu1 %v2532_v13  ;;  %v446_v34 = vmul.f32 %v3306_v60, %v3202_v31  ;;  %v445_v55 = vmul.f32 %v3308_v1, %v3200_v30 }
 0x1cb   :  { %v3350_v23 = vpop.permute.xlu1 %780  ;;  %v3352_v41 = vpop.permute.xlu0 %775  ;;  %v654_v1 = vmul.f32 %v3318_v19, %v3218_v48 }
 0x1cc   :  { %820 = vperm.xlu1 %2526, %v726_v45   ;;  %815 = vperm.xlu0 %2525, %v725_v46   ;;  %v1233_v61 = vpack.c.bf16 %v1212_v40, %v1211_v4  ;;  %v702_v45 = vadd.f32 %v670_v49, %v446_v34  ;;  %v701_v46 = vadd.f32 %v669_v33, %v445_v55  ;;  %v1278_v49 = vld [vmem:[#allocation14 + $0x38] sm:$0xff]  ;;  %v1277_v33 = vld [vmem:[#allocation14 + $0x30] sm:$0xff]  ;;  %v1296_v34 = vld [vmem:[#allocation14 + $0xc8] sm:$0xff] }
 0x1cd   :  { %v910_v19 = vmul.f32 %v3350_v23, %v3222_v52  ;;  %v1295_v55 = vld [vmem:[#allocation14 + $0xc0] sm:$0xff] }
 0x1ce   :  { %2300 = vmatprep.subr.bf16.mxu0 %v1233_v61  ;;  %2491 = vmatprep.subr.bf16.mxu1 %v1233_v61  ;;  %v958_v60 = vadd.f32 %v926_v38, %v702_v45  ;;  %v957_v40 = vadd.f32 %v925_v7, %v701_v46  ;;  %v430_v61 = vmul.f32 %v3314_v11, %v3202_v31  ;;  %v1280_v45 = vld [vmem:[#allocation14 + $0x48] sm:$0xff]  ;;  %v1279_v46 = vld [vmem:[#allocation14 + $0x40] sm:$0xff] }
 0x1cf   :  { %v1027_v51 = vpop.permute.xlu1 %1026  ;;  %v1022_v56 = vpop.permute.xlu0 %1021 }
 0x1d0   :  { %v1164_v37 = vadd.f32 %v1027_v51, %v940_v50  ;;  %v1163_v59 = vadd.f32 %v1022_v56, %v939_v24  ;;  %1066 = vperm.xlu1 %2526, %v980_v62   ;;  %1061 = vperm.xlu0 %2525, %v979_v43   ;;  %v429_v62 = vmul.f32 %v3316_v14, %v3200_v30  ;;  %v1292_v43 = vld [vmem:[#allocation14 + $0xa8] sm:$0xff]  ;;  %v1291_v50 = vld [vmem:[#allocation14 + $0xa0] sm:$0xff] }
 0x1d1   :  { %v909_v24 = vmul.f32 %v3352_v41, %v3224_v53  ;;  %v1276_v14 = vld [vmem:[#allocation14 + $0x28] sm:$0xff] }
 0x1d2   :  { %v1196_v6 = vmax.f32 %v1164_v37, 0.0  ;;  %v1195_v9 = vmax.f32 %v1163_v59, 0.0  ;;  %v686_v59 = vadd.f32 %v654_v1, %v430_v61  ;;  %v1298_v1 = vld [vmem:[#allocation14 + $0xd8] sm:$0xff] }
 0x1d3   :  { %v3354_v10 = vpop.permute.xlu1 %390  ;;  %v3356_v36 = vpop.permute.xlu0 %385 }
 0x1d4   :  { %1156 = vperm.xlu1 %2526, %v998_v2   ;;  %1151 = vperm.xlu0 %2525, %v997_v5   ;;  %v1225_v18 = vpack.c.bf16 %v1196_v6, %v1195_v9  ;;  %v685_v2 = vadd.f32 %v653_v27, %v429_v62  ;;  %v1275_v5 = vld [vmem:[#allocation14 + $0x20] sm:$0xff]  ;;  %v942_v6 = vadd.f32 %v910_v19, %v686_v59 }
 0x1d5   :  { %v447_v27 = vmul.f32 %v3356_v36, %v3200_v30 }
 0x1d6   :  { %2301 = vmatpush3.bf16.msra.mxu0 %v1225_v18  ;;  %2499 = vmatpush3.bf16.msra.mxu1 %v1225_v18  ;;  %v941_v23 = vadd.f32 %v909_v24, %v685_v2 }
 0x1d7   :  { %v3358_v29 = vpop.permute.xlu1 %614  ;;  %v3360_v21 = vpop.permute.xlu0 %609 }
 0x1d8   :  { %1076 = vperm.xlu1 %2526, %v982_v28   ;;  %1071 = vperm.xlu0 %2525, %v981_v16   ;;  %v1294_v16 = vld [vmem:[#allocation14 + $0xb8] sm:$0xff] }
 0x1db   :  { %v3362_v22 = vpop.permute.xlu1 %310  ;;  %v3364_v17 = vpop.permute.xlu0 %305 }
 0x1dc   :  { %1390 = vperm.xlu1 %2526, %v1288_v63   ;;  %1385 = vperm.xlu0 %2525, %v1287_v0   ;;  %v1293_v63 = vld [vmem:[#allocation14 + $0xb0] sm:$0xff]  ;;  %v432_v59 = vmul.f32 %v3362_v22, %v3202_v31  ;;  %v431_v2 = vmul.f32 %v3364_v17, %v3200_v30  ;;  %v1284_v17 = vld [vmem:[#allocation14 + $0x68] sm:$0xff] }
 0x1df   :  { %v3366_v44 = vpop.permute.xlu1 %534  ;;  %v3368_v54 = vpop.permute.xlu0 %529 }
 0x1e0   :  { %1310 = vperm.xlu1 %2526, %v1272_v58   ;;  %1305 = vperm.xlu0 %2525, %v1271_v32   ;;  %v656_v36 = vmul.f32 %v3366_v44, %v3218_v48 }
 0x1e3   :  { %v3382_v25 = vpop.permute.xlu1 %870  ;;  %v3384_v8 = vpop.permute.xlu0 %865 }
 0x1e4   :  { %1400 = vperm.xlu1 %2526, %v1290_v35   ;;  %1395 = vperm.xlu0 %2525, %v1289_v15  }
 0x1e7   :  { %v1117_v4 = vpop.permute.xlu1 %1116  ;;  %v1112_v57 = vpop.permute.xlu0 %1111 }
 0x1e8   :  { %v1182_v42 = vadd.f32 %v1117_v4, %v958_v60  ;;  %v1181_v26 = vadd.f32 %v1112_v57, %v957_v40  ;;  %1320 = vperm.xlu1 %2526, %v1274_v3   ;;  %1315 = vperm.xlu0 %2525, %v1273_v39   ;;  %v672_v60 = vmul.f32 %v3358_v29, %v3218_v48  ;;  %v1297_v4 = vld [vmem:[#allocation14 + $0xd0] sm:$0xff] }
 0x1e9   :  { %v671_v40 = vmul.f32 %v3360_v21, %v3216_v47  ;;  %v448_v57 = vmul.f32 %v3354_v10, %v3202_v31 }
 0x1ea   :  { %v1214_v51 = vmax.f32 %v1182_v42, 0.0  ;;  %v1213_v20 = vmax.f32 %v1181_v26, 0.0  ;;  %v928_v42 = vmul.f32 %v3382_v25, %v3222_v52  ;;  %v927_v26 = vmul.f32 %v3384_v8, %v3224_v53 }
 0x1eb   :  { %v3398_v56 = vpop.permute.xlu1 %790  ;;  %v3400_v37 = vpop.permute.xlu0 %785  ;;  %v704_v21 = vadd.f32 %v672_v60, %v448_v57  ;;  %v703_v62 = vadd.f32 %v671_v40, %v447_v27  ;;  %v655_v8 = vmul.f32 %v3368_v54, %v3216_v47  ;;  %v1286_v60 = vld [vmem:[#allocation14 + $0x78] sm:$0xff]  ;;  %v1285_v40 = vld [vmem:[#allocation14 + $0x70] sm:$0xff]  ;;  %v1841_v57 = vld [vmem:[#allocation17 + $0x8] sm:$0xff] }
 0x1ec   :  { %1410 = vperm.xlu1 %2526, %v1292_v43   ;;  %1405 = vperm.xlu0 %2525, %v1291_v50   ;;  %v1234_v11 = vpack.c.bf16 %v1214_v51, %v1213_v20  ;;  %v1282_v43 = vld [vmem:[#allocation14 + $0x58] sm:$0xff]  ;;  %v1281_v50 = vld [vmem:[#allocation14 + $0x50] sm:$0xff]  ;;  %v912_v44 = vmul.f32 %v3398_v56, %v3222_v52  ;;  %v1840_v27 = vld [vmem:[#allocation17] sm:$0xff] }
 0x1ed   :  { %v960_v10 = vadd.f32 %v928_v42, %v704_v21  ;;  %v959_v19 = vadd.f32 %v927_v26, %v703_v62  ;;  %v1843_v21 = vld [vmem:[#allocation17 + $0x18] sm:$0xff]  ;;  %v1842_v62 = vld [vmem:[#allocation17 + $0x10] sm:$0xff] }
 0x1ee   :  { %2302 = vmatprep.subr.bf16.mxu0 %v1234_v11  ;;  %2492 = vmatprep.subr.bf16.mxu1 %v1234_v11  ;;  %v1300_v11 = vld [vmem:[#allocation14 + $0xe8] sm:$0xff] }
 0x1ef   :  { %v1037_v9 = vpop.permute.xlu1 %1036  ;;  %v1032_v18 = vpop.permute.xlu0 %1031 }
 0x1f0   :  { %v1166_v41 = vadd.f32 %v1037_v9, %v942_v6  ;;  %v1165_v28 = vadd.f32 %v1032_v18, %v941_v23  ;;  %1330 = vperm.xlu1 %2526, %v1276_v14   ;;  %1325 = vperm.xlu0 %2525, %v1275_v5   ;;  %v1299_v14 = vld [vmem:[#allocation14 + $0xe0] sm:$0xff]  ;;  %v911_v5 = vmul.f32 %v3400_v37, %v3224_v53 }
 0x1f1   :  { %v688_v18 = vadd.f32 %v656_v36, %v432_v59  ;;  %v1845_v36 = vld [vmem:[#allocation17 + $0x28] sm:$0xff] }
 0x1f2   :  { %v1198_v0 = vmax.f32 %v1166_v41, 0.0  ;;  %v1197_v58 = vmax.f32 %v1165_v28, 0.0  ;;  %v687_v41 = vadd.f32 %v655_v8, %v431_v2  ;;  %v1283_v28 = vld [vmem:[#allocation14 + $0x60] sm:$0xff] }
 0x1f3   :  { %v3402_v32 = vpop.permute.xlu1 %400  ;;  %v3404_v12 = vpop.permute.xlu0 %395 }
 0x1f4   :  { %1420 = vperm.xlu1 %2526, %v1294_v16   ;;  %1415 = vperm.xlu0 %2525, %v1293_v63   ;;  %v1226_v13 = vpack.c.bf16 %v1198_v0, %v1197_v58  ;;  %v944_v16 = vadd.f32 %v912_v44, %v688_v18  ;;  %v943_v56 = vadd.f32 %v911_v5, %v687_v41 }
 0x1f5   :  { %v449_v8 = vmul.f32 %v3404_v12, %v3200_v30 }
 0x1f6   :  { %2303 = vmatpush3.bf16.msra.mxu0 %v1226_v13  ;;  %2500 = vmatpush3.bf16.msra.mxu1 %v1226_v13  ;;  %v1302_v13 = vld [vmem:[#allocation14 + $0xf8] sm:$0xff] }
 0x1f7   :  { %v3406_v35 = vpop.permute.xlu1 %624  ;;  %v3408_v15 = vpop.permute.xlu0 %619 }
 0x1f8   :  { %1340 = vperm.xlu1 %2526, %v1278_v49   ;;  %1335 = vperm.xlu0 %2525, %v1277_v33   ;;  %v1301_v49 = vld [vmem:[#allocation14 + $0xf0] sm:$0xff] }
 0x1fb   :  { %v3410_v38 = vpop.permute.xlu1 %320  ;;  %v3412_v7 = vpop.permute.xlu0 %315 }
 0x1fc   :  { %1430 = vperm.xlu1 %2526, %v1296_v34   ;;  %1425 = vperm.xlu0 %2525, %v1295_v55   ;;  %v434_v18 = vmul.f32 %v3410_v38, %v3202_v31  ;;  %v433_v41 = vmul.f32 %v3412_v7, %v3200_v30  ;;  %v2016_v30 = vld [vmem:[#allocation20 + $0x18] sm:$0xff]  ;;  %v2015_v38 = vld [vmem:[#allocation20 + $0x10] sm:$0xff] }
 0x1ff   :  { %v3414_v3 = vpop.permute.xlu1 %544  ;;  %v3416_v39 = vpop.permute.xlu0 %539 }
 0x200   :  { %1350 = vperm.xlu1 %2526, %v1280_v45   ;;  %1345 = vperm.xlu0 %2525, %v1279_v46   ;;  %v658_v12 = vmul.f32 %v3414_v3, %v3218_v48 }
 0x203   :  { %v3430_v29 = vpop.permute.xlu1 %880  ;;  %v3432_v61 = vpop.permute.xlu0 %875 }
 0x204   :  { %1440 = vperm.xlu1 %2526, %v1298_v1   ;;  %1435 = vperm.xlu0 %2525, %v1297_v4  }
 0x207   :  { %v1127_v24 = vpop.permute.xlu1 %1126  ;;  %v1122_v25 = vpop.permute.xlu0 %1121 }
 0x208   :  { %v1184_v51 = vadd.f32 %v1127_v24, %v960_v10  ;;  %v1183_v20 = vadd.f32 %v1122_v25, %v959_v19  ;;  %1360 = vperm.xlu1 %2526, %v1282_v43   ;;  %1355 = vperm.xlu0 %2525, %v1281_v50   ;;  %v674_v10 = vmul.f32 %v3406_v35, %v3218_v48  ;;  %v1844_v24 = vld [vmem:[#allocation17 + $0x20] sm:$0xff] }
 0x209   :  { %v673_v19 = vmul.f32 %v3408_v15, %v3216_v47  ;;  %v450_v25 = vmul.f32 %v3402_v32, %v3202_v31 }
 0x20a   :  { %v1216_v6 = vmax.f32 %v1184_v51, 0.0  ;;  %v1215_v54 = vmax.f32 %v1183_v20, 0.0  ;;  %v930_v51 = vmul.f32 %v3430_v29, %v3222_v52  ;;  %v929_v20 = vmul.f32 %v3432_v61, %v3224_v53 }
 0x20b   :  { %v3446_v23 = vpop.permute.xlu1 %800  ;;  %v3448_v9 = vpop.permute.xlu0 %795  ;;  %v706_v15 = vadd.f32 %v674_v10, %v450_v25  ;;  %v705_v2 = vadd.f32 %v673_v19, %v449_v8  ;;  %v657_v61 = vmul.f32 %v3416_v39, %v3216_v47 }
 0x20c   :  { %v1235_v22 = vpack.c.bf16 %v1216_v6, %v1215_v54  ;;  %1450 = vperm.xlu1 %2526, %v1300_v11   ;;  %1445 = vperm.xlu0 %2525, %v1299_v14   ;;  %v1847_v11 = vld [vmem:[#allocation17 + $0x38] sm:$0xff]  ;;  %v1846_v14 = vld [vmem:[#allocation17 + $0x30] sm:$0xff]  ;;  %v914_v3 = vmul.f32 %v3446_v23, %v3222_v52 }
 0x20d   :  { %v962_v32 = vadd.f32 %v930_v51, %v706_v15  ;;  %v961_v44 = vadd.f32 %v929_v20, %v705_v2  ;;  %v2591_v2 = vld [vmem:[#allocation3 + $0x8] sm:$0xff] }
 0x20e   :  { %2304 = vmatprep.subr.bf16.mxu0 %v1235_v22  ;;  %2493 = vmatprep.subr.bf16.mxu1 %v1235_v22  ;;  %v2014_v22 = vld [vmem:[#allocation20 + $0x8] sm:$0xff] }
 0x20f   :  { %v1047_v63 = vpop.permute.xlu1 %1046  ;;  %v1042_v0 = vpop.permute.xlu0 %1041 }
 0x210   :  { %v1168_v37 = vadd.f32 %v1047_v63, %v944_v16  ;;  %v1167_v58 = vadd.f32 %v1042_v0, %v943_v56  ;;  %1370 = vperm.xlu1 %2526, %v1284_v17   ;;  %1365 = vperm.xlu0 %2525, %v1283_v28   ;;  %v2013_v17 = vld [vmem:[#allocation20] sm:$0xff]  ;;  %v913_v28 = vmul.f32 %v3448_v9, %v3224_v53 }
 0x211   :  { %v690_v0 = vadd.f32 %v658_v12, %v434_v18 }
 0x212   :  { %v1200_v33 = vmax.f32 %v1168_v37, 0.0  ;;  %v1199_v34 = vmax.f32 %v1167_v58, 0.0  ;;  %v689_v37 = vadd.f32 %v657_v61, %v433_v41 }
 0x213   :  { %v3450_v55 = vpop.permute.xlu1 %410  ;;  %v3452_v45 = vpop.permute.xlu0 %405  ;;  %v946_v7 = vadd.f32 %v914_v3, %v690_v0 }
 0x214   :  { %v1227_v46 = vpack.c.bf16 %v1200_v33, %v1199_v34  ;;  %1460 = vperm.xlu1 %2526, %v1302_v13   ;;  %1455 = vperm.xlu0 %2525, %v1301_v49   ;;  %v945_v23 = vadd.f32 %v913_v28, %v689_v37  ;;  %v2018_v33 = vld [vmem:[#allocation20 + $0x28] sm:$0xff]  ;;  %v2017_v34 = vld [vmem:[#allocation20 + $0x20] sm:$0xff] }
 0x216   :  { %2305 = vmatpush3.bf16.msra.mxu0 %v1227_v46  ;;  %2501 = vmatpush3.bf16.msra.mxu1 %v1227_v46 }
 0x217   :  { %v3454_v1 = vpop.permute.xlu1 %634  ;;  %v3456_v4 = vpop.permute.xlu0 %629 }
 0x218   :  { %1380 = vperm.xlu1 %2526, %v1286_v60   ;;  %1375 = vperm.xlu0 %2525, %v1285_v40   ;;  %v676_v20 = vmul.f32 %v3454_v1, %v3218_v48  ;;  %v675_v15 = vmul.f32 %v3456_v4, %v3216_v47 }
 0x21b   :  { %v3458_v42 = vpop.permute.xlu1 %330  ;;  %v3460_v26 = vpop.permute.xlu0 %325 }
 0x21c   :  { %1855 = vperm.xlu1 %2526, %v1841_v57   ;;  %1850 = vperm.xlu0 %2525, %v1840_v27  }
 0x21f   :  { %v3462_v43 = vpop.permute.xlu1 %554  ;;  %v3464_v50 = vpop.permute.xlu0 %549 }
 0x220   :  { %1865 = vperm.xlu1 %2526, %v1843_v21   ;;  %1860 = vperm.xlu0 %2525, %v1842_v62   ;;  %v2020_v21 = vld [vmem:[#allocation20 + $0x38] sm:$0xff]  ;;  %v2019_v62 = vld [vmem:[#allocation20 + $0x30] sm:$0xff] }
 0x223   :  { %v3478_v35 = vpop.permute.xlu1 %890  ;;  %v3480_v59 = vpop.permute.xlu0 %885 }
 0x224   :  { %1875 = vperm.xlu1 %2526, %v1845_v36   ;;  %1870 = vperm.xlu0 %2525, %v1844_v24   ;;  %v2172_v36 = vld [vmem:[#allocation2] sm:$0x1]  ;;  %v931_v12 = vmul.f32 %v3480_v59, %v3224_v53 }
 0x227   :  { %v1137_v5 = vpop.permute.xlu1 %1136  ;;  %v1132_v29 = vpop.permute.xlu0 %1131 }
 0x228   :  { %v1186_v6 = vadd.f32 %v1137_v5, %v962_v32  ;;  %v1185_v54 = vadd.f32 %v1132_v29, %v961_v44  ;;  %1885 = vperm.xlu1 %2526, %v1847_v11   ;;  %1880 = vperm.xlu0 %2525, %v1846_v14   ;;  %v452_v11 = vmul.f32 %v2591_v2, %v3450_v55  ;;  %v2592_v14 = vld [vmem:[#allocation3] sm:$0xff] }
 0x229   :  { %v451_v32 = vmul.f32 %v2592_v14, %v3452_v45  ;;  %v932_v44 = vmul.f32 %v3478_v35, %v3222_v52  ;;  %v660_v55 = vmul.f32 %v3462_v43, %v3218_v48  ;;  %v659_v45 = vmul.f32 %v3464_v50, %v3216_v47 }
 0x22a   :  { %v1218_v16 = vmax.f32 %v1186_v6, 0.0  ;;  %v1217_v39 = vmax.f32 %v1185_v54, 0.0  ;;  %v708_v61 = vadd.f32 %v676_v20, %v452_v11  ;;  %v436_v35 = vmul.f32 %v2591_v2, %v3458_v42 }
 0x22b   :  { %v3494_v56 = vpop.permute.xlu1 %810  ;;  %v3496_v63 = vpop.permute.xlu0 %805  ;;  %v707_v6 = vadd.f32 %v675_v15, %v451_v32  ;;  %v435_v59 = vmul.f32 %v2592_v14, %v3460_v26 }
 0x22c   :  { %v1236_v31 = vpack.c.bf16 %v1218_v16, %v1217_v39  ;;  %2028 = vperm.xlu1 %2526, %v2014_v22   ;;  %2023 = vperm.xlu0 %2525, %v2013_v17   ;;  %v964_v1 = vadd.f32 %v932_v44, %v708_v61  ;;  %v916_v17 = vmul.f32 %v3494_v56, %v3222_v52  ;;  %v2527_v61 = vld [vmem:[#allocation12] ss:$8 sps:$4 sm:$0xff]  }
 0x22d   :  { %v963_v54 = vadd.f32 %v931_v12, %v707_v6  ;;  %v915_v3 = vmul.f32 %v3496_v63, %v3224_v53  ;;  %v692_v37 = vadd.f32 %v660_v55, %v436_v35  ;;  %v2530_v6 = vld [vmem:[#allocation12 + $0xc0] ss:$8 sps:$4 sm:$0xff]   ;;  %v2539_v55 = vld [vmem:[#allocation12 + $0x24] ss:$8 sps:$4 sm:$0xff]   ;;  %v2545_v35 = vld [vmem:[#allocation12 + $0x34] ss:$8 sps:$4 sm:$0xff]  }
 0x22e   :  { %2306 = vmatprep.subr.bf16.mxu0 %v1236_v31  ;;  %2494 = vmatprep.subr.bf16.mxu1 %v1236_v31  ;;  %v691_v31 = vadd.f32 %v659_v45, %v435_v59  ;;  %v2541_v45 = vld [vmem:[#allocation12 + $0xe4] ss:$8 sps:$4 sm:$0xff]   ;;  %v2547_v59 = vld [vmem:[#allocation12 + $0xf4] ss:$8 sps:$4 sm:$0xff]  }
 0x22f   :  { %v1057_v58 = vpop.permute.xlu1 %1056  ;;  %v1052_v13 = vpop.permute.xlu0 %1051  ;;  %v948_v63 = vadd.f32 %v916_v17, %v692_v37  ;;  %v2549_v17 = vld [vmem:[#allocation12 + $0x30] ss:$8 sps:$4 sm:$0xff]   ;;  %v2560_v37 = vld [vmem:[#allocation12 + $0x74] ss:$8 sps:$4 sm:$0xff]  }
 0x230   :  { %v1170_v9 = vadd.f32 %v1057_v58, %v946_v7  ;;  %v1169_v49 = vadd.f32 %v1052_v13, %v945_v23  ;;  %2038 = vperm.xlu1 %2526, %v2016_v30   ;;  %2033 = vperm.xlu0 %2525, %v2015_v38   ;;  %v947_v7 = vadd.f32 %v915_v3, %v691_v31  ;;  %v2550_v3 = vld [vmem:[#allocation12 + $0xf0] ss:$8 sps:$4 sm:$0xff]  }
 0x231   :  { %v2562_v31 = vld [vmem:[#allocation12 + $0x70] ss:$8 sps:$4 sm:$0xff]  }
 0x232   :  { %v1202_v46 = vmax.f32 %v1170_v9, 0.0  ;;  %v1201_v60 = vmax.f32 %v1169_v49, 0.0 }
 0x233   :  { %v421_v40 = vpop.permute.xlu1 %420  ;;  %v416_v57 = vpop.permute.xlu0 %415 }
 0x234   :  { %v1228_v27 = vpack.c.bf16 %v1202_v46, %v1201_v60  ;;  %2048 = vperm.xlu1 %2526, %v2018_v33   ;;  %2043 = vperm.xlu0 %2525, %v2017_v34   ;;  %v454_v42 = vmul.f32 %v2591_v2, %v421_v40  ;;  %v453_v38 = vmul.f32 %v2592_v14, %v416_v57 }
 0x236   :  { %2307 = vmatpush3.bf16.msra.mxu0 %v1228_v27  ;;  %2502 = vmatpush3.bf16.msra.mxu1 %v1228_v27 }
 0x237   :  { %v645_v10 = vpop.permute.xlu1 %644  ;;  %v640_v19 = vpop.permute.xlu0 %639 }
 0x238   :  { %2058 = vperm.xlu1 %2526, %v2020_v21   ;;  %2053 = vperm.xlu0 %2525, %v2019_v62   ;;  %v678_v39 = vmul.f32 %v645_v10, %v3218_v48  ;;  %v677_v43 = vmul.f32 %v640_v19, %v3216_v47 }
 0x23a   :  { %v710_v23 = vadd.f32 %v678_v39, %v454_v42  ;;  %v709_v58 = vadd.f32 %v677_v43, %v453_v38  ;;  %v2554_v39 = vld [vmem:[#allocation12 + $0x54] ss:$8 sps:$4 sm:$0xff]   ;;  %v2556_v43 = vld [vmem:[#allocation12 + $0x50] ss:$8 sps:$4 sm:$0xff]   ;;  %v2565_v42 = vld [vmem:[#allocation12 + $0x80] ss:$8 sps:$4 sm:$0xff]  }
 0x23b   :  { %v341_v24 = vpop.permute.xlu1 %340  ;;  %v336_v25 = vpop.permute.xlu0 %335  ;;  %v2566_v38 = vld [vmem:[#allocation12 + $0x94] ss:$8 sps:$4 sm:$0xff]  }
 0x23c   :  { %2175 = vperm.xlu0 %2525, %v2172_v36   ;;  %v438_v60 = vmul.f32 %v2591_v2, %v341_v24  ;;  %v437_v40 = vmul.f32 %v2592_v14, %v336_v25 }
 0x23f   :  { %v565_v8 = vpop.permute.xlu1 %564  ;;  %v560_v51 = vpop.permute.xlu0 %559 }
 0x240   :  { %v662_v13 = vmul.f32 %v565_v8, %v3218_v48  ;;  %v661_v33 = vmul.f32 %v560_v51, %v3216_v47 }
 0x242   :  { %v694_v36 = vadd.f32 %v662_v13, %v438_v60  ;;  %v693_v48 = vadd.f32 %v661_v33, %v437_v40 }
 0x243   :  { %v901_v5 = vpop.permute.xlu1 %900  ;;  %v896_v29 = vpop.permute.xlu0 %895 }
 0x244   :  { %v934_v26 = vmul.f32 %v901_v5, %v3222_v52  ;;  %v933_v56 = vmul.f32 %v896_v29, %v3224_v53 }
 0x246   :  { %v966_v57 = vadd.f32 %v934_v26, %v710_v23  ;;  %v965_v27 = vadd.f32 %v933_v56, %v709_v58  ;;  %v2568_v26 = vld [vmem:[#allocation12 + $0x90] ss:$8 sps:$4 sm:$0xff]   ;;  %v2569_v56 = vld [vmem:[#allocation12 + $0xa4] ss:$8 sps:$4 sm:$0xff]  }
 0x247   :  { %v1147_v18 = vpop.permute.xlu1 %1146  ;;  %v1142_v4 = vpop.permute.xlu0 %1141  ;;  %v2574_v23 = vld [vmem:[#allocation12 + $0xb0] ss:$8 sps:$4 sm:$0xff]  }
 0x248   :  { %v1188_v41 = vadd.f32 %v1147_v18, %v964_v1  ;;  %v1187_v22 = vadd.f32 %v1142_v4, %v963_v54  ;;  %v2533_v1 = vld [vmem:[#allocation12 + $0x14] ss:$8 sps:$4 sm:$0xff]   ;;  %v2537_v18 = vld [vmem:[#allocation12 + $0x10] ss:$8 sps:$4 sm:$0xff]  }
 0x249   :  { %v2535_v54 = vld [vmem:[#allocation12 + $0xd4] ss:$8 sps:$4 sm:$0xff]   ;;  %v2538_v4 = vld [vmem:[#allocation12 + $0xd0] ss:$8 sps:$4 sm:$0xff]  }
 0x24a   :  { %v1220_v28 = vmax.f32 %v1188_v41, 0.0  ;;  %v1219_v16 = vmax.f32 %v1187_v22, 0.0  ;;  %v2543_v41 = vld [vmem:[#allocation12 + $0x20] ss:$8 sps:$4 sm:$0xff]  }
 0x24b   :  { %v821_v0 = vpop.permute.xlu1 %820  ;;  %v816_v50 = vpop.permute.xlu0 %815  ;;  %v2544_v22 = vld [vmem:[#allocation12 + $0xe0] ss:$8 sps:$4 sm:$0xff]  }
 0x24c   :  { %v1237_v30 = vpack.c.bf16 %v1220_v28, %v1219_v16  ;;  %v918_v21 = vmul.f32 %v821_v0, %v3222_v52  ;;  %v917_v62 = vmul.f32 %v816_v50, %v3224_v53  ;;  %v2551_v28 = vld [vmem:[#allocation12 + $0x44] ss:$8 sps:$4 sm:$0xff]   ;;  %v2553_v16 = vld [vmem:[#allocation12 + $0x40] ss:$8 sps:$4 sm:$0xff]  }
 0x24d   :  { %v2557_v0 = vld [vmem:[#allocation12 + $0x64] ss:$8 sps:$4 sm:$0xff]   ;;  %v2559_v50 = vld [vmem:[#allocation12 + $0x60] ss:$8 sps:$4 sm:$0xff]  }
 0x24e   :  { %2308 = vmatprep.subr.bf16.mxu0 %v1237_v30  ;;  %2495 = vmatprep.subr.bf16.mxu1 %v1237_v30  ;;  %v950_v24 = vadd.f32 %v918_v21, %v694_v36  ;;  %v949_v25 = vadd.f32 %v917_v62, %v693_v48  ;;  %v2563_v30 = vld [vmem:[#allocation12 + $0x84] ss:$8 sps:$4 sm:$0xff]  }
 0x24f   :  { %v1067_v9 = vpop.permute.xlu1 %1066  ;;  %v1062_v49 = vpop.permute.xlu0 %1061 }
 0x250   :  { %v1172_v34 = vadd.f32 %v1067_v9, %v948_v63  ;;  %v1171_v46 = vadd.f32 %v1062_v49, %v947_v7  ;;  %v2571_v63 = vld [vmem:[#allocation12 + $0xa0] ss:$8 sps:$4 sm:$0xff]   ;;  %v2572_v7 = vld [vmem:[#allocation12 + $0xb4] ss:$8 sps:$4 sm:$0xff]  }
 0x252   :  { %v1204_v10 = vmax.f32 %v1172_v34, 0.0  ;;  %v1203_v19 = vmax.f32 %v1171_v46, 0.0 }
 0x253   :  { %v1157_v20 = vpop.permute.xlu1 %1156  ;;  %v1152_v15 = vpop.permute.xlu0 %1151 }
 0x254   :  { %v1229_v8 = vpack.c.bf16 %v1204_v10, %v1203_v19  ;;  %v1190_v11 = vadd.f32 %v1157_v20, %v966_v57  ;;  %v1189_v32 = vadd.f32 %v1152_v15, %v965_v27 }
 0x256   :  { %v1222_v47 = vmax.f32 %v1190_v11, 0.0  ;;  %v1221_v51 = vmax.f32 %v1189_v32, 0.0  ;;  %2309 = vmatpush3.bf16.msra.mxu0 %v1229_v8  ;;  %2503 = vmatpush3.bf16.msra.mxu1 %v1229_v8  ;;  %v2577_v8 = vld [vmem:[#allocation15 + $0x4] ss:$8 sps:$4 sm:$0xff]  }
 0x257   :  { %v1077_v2 = vpop.permute.xlu1 %1076  ;;  %v1072_v14 = vpop.permute.xlu0 %1071 }
 0x258   :  { %v1238_v52 = vpack.c.bf16 %v1222_v47, %v1221_v51  ;;  %v1174_v44 = vadd.f32 %v1077_v2, %v950_v24  ;;  %v1173_v53 = vadd.f32 %v1072_v14, %v949_v25 }
 0x25a   :  { %v1206_v12 = vmax.f32 %v1174_v44, 0.0  ;;  %v1205_v5 = vmax.f32 %v1173_v53, 0.0  ;;  %2310 = vmatprep.subr.bf16.mxu0 %v1238_v52  ;;  %2496 = vmatprep.subr.bf16.mxu1 %v1238_v52 }
 0x25b   :  { %v3526_v58 = vpop.permute.xlu0 %1385  ;;  %v3528_v13 = vpop.permute.xlu1 %1390 }
 0x25c   :  { %v1230_v29 = vpack.c.bf16 %v1206_v12, %v1205_v5 }
 0x25e   :  { %2311 = vmatpush3.bf16.msra.mxu0 %v1230_v29  ;;  %2504 = vmatpush3.bf16.msra.mxu1 %v1230_v29 }
 0x25f   :  { %v1306_v9 = vpop.permute.xlu0 %1305  ;;  %v1311_v49 = vpop.permute.xlu1 %1310 }
 0x261   :  { %1656 = vmatmul.mubr.bf16.vlgmr.msra.gmra.mrb[0].mxu0 %v2527_v61  ;;  %1752 = vmatmul.mubr.bf16.vlgmr.msra.gmra.mrb[0].mxu1 %v2530_v6 }
 0x262   :  { %1663 = vmatprep.mubr.bf16.mxu0 %v2533_v1  ;;  %1759 = vmatprep.mubr.bf16.mxu1 %v2535_v54 }
 0x263   :  { %v3530_v33 = vpop.permute.xlu0 %1395  ;;  %v3532_v34 = vpop.permute.xlu1 %1400 }
 0x267   :  { %v1316_v46 = vpop.permute.xlu0 %1315  ;;  %v1321_v60 = vpop.permute.xlu1 %1320 }
 0x269   :  { %1664 = vmatmul.mubr.bf16.gmra.mrb[4].mxu0 %v2537_v18  ;;  %1760 = vmatmul.mubr.bf16.gmra.mrb[4].mxu1 %v2538_v4 }
 0x26a   :  { %1671 = vmatprep.mubr.bf16.mxu0 %v2539_v55  ;;  %1767 = vmatprep.mubr.bf16.mxu1 %v2541_v45 }
 0x26b   :  { %v3534_v40 = vpop.permute.xlu0 %1405  ;;  %v3536_v57 = vpop.permute.xlu1 %1410 }
 0x26f   :  { %v3538_v27 = vpop.permute.xlu0 %1325  ;;  %v3540_v21 = vpop.permute.xlu1 %1330 }
 0x271   :  { %1672 = vmatmul.mubr.bf16.gmra.mrb[8].mxu0 %v2543_v41  ;;  %1768 = vmatmul.mubr.bf16.gmra.mrb[8].mxu1 %v2544_v22 }
 0x272   :  { %1679 = vmatprep.mubr.bf16.mxu0 %v2545_v35  ;;  %1775 = vmatprep.mubr.bf16.mxu1 %v2547_v59 }
 0x273   :  { %v3542_v62 = vpop.permute.xlu0 %1415  ;;  %v3544_v10 = vpop.permute.xlu1 %1420 }
 0x277   :  { %v3546_v19 = vpop.permute.xlu0 %1335  ;;  %v3548_v36 = vpop.permute.xlu1 %1340 }
 0x279   :  { %1680 = vmatmul.mubr.bf16.gmra.mrb[12].mxu0 %v2549_v17  ;;  %1776 = vmatmul.mubr.bf16.gmra.mrb[12].mxu1 %v2550_v3 }
 0x27a   :  { %1687 = vmatprep.mubr.bf16.mxu0 %v2551_v28  ;;  %1960 = vmatprep.mubr.bf16.mxu1 %v2577_v8 }
 0x27b   :  { %v1426_v20 = vpop.permute.xlu0 %1425  ;;  %v1431_v15 = vpop.permute.xlu1 %1430 }
 0x27f   :  { %v3550_v48 = vpop.permute.xlu0 %1345  ;;  %v3552_v11 = vpop.permute.xlu1 %1350 }
 0x281   :  { %1688 = vmatmul.mubr.bf16.gmra.mrb[16].mxu0 %v2553_v16 }
 0x282   :  { %1695 = vmatprep.mubr.bf16.mxu0 %v2554_v39 }
 0x283   :  { %v1436_v32 = vpop.permute.xlu0 %1435  ;;  %v1441_v47 = vpop.permute.xlu1 %1440 }
 0x287   :  { %v3554_v51 = vpop.permute.xlu0 %1355  ;;  %v3556_v55 = vpop.permute.xlu1 %1360 }
 0x289   :  { %1696 = vmatmul.mubr.bf16.gmra.mrb[20].mxu0 %v2556_v43 }
 0x28a   :  { %1703 = vmatprep.mubr.bf16.mxu0 %v2557_v0 }
 0x28b   :  { %v1446_v45 = vpop.permute.xlu0 %1445 }
 0x291   :  { %1704 = vmatmul.mubr.bf16.gmra.mrb[24].mxu0 %v2559_v50 }
 0x292   :  { %1711 = vmatprep.mubr.bf16.mxu0 %v2560_v37 }
 0x299   :  { %1712 = vmatmul.mubr.bf16.gmra.mrb[28].mxu0 %v2562_v31 }
 0x29a   :  { %1719 = vmatprep.mubr.bf16.mxu0 %v2563_v30 }
 0x2a1   :  { %1720 = vmatmul.mubr.bf16.gmra.mrb[32].mxu0 %v2565_v42 }
 0x2a2   :  { %1727 = vmatprep.mubr.bf16.mxu0 %v2566_v38 }
 0x2a9   :  { %1728 = vmatmul.mubr.bf16.gmra.mrb[36].mxu0 %v2568_v26 }
 0x2aa   :  { %1735 = vmatprep.mubr.bf16.mxu0 %v2569_v56 }
 0x2b1   :  { %1736 = vmatmul.mubr.bf16.gmra.mrb[40].mxu0 %v2571_v63 }
 0x2b2   :  { %1743 = vmatprep.mubr.bf16.mxu0 %v2572_v7 }
 0x2b9   :  { %1744 = vmatmul.mubr.bf16.gmra.mrb[44].mxu0 %v2574_v23 }
 0x334   :  { %v2312_v24 = vpop.f32.mrb[0].mxu0  ;;  %v2384_v25 = vpop.f32.mrb[0].mxu1 }
 0x335   :  { %v2313_v2 = vpop.f32.mrb[1].mxu0  ;;  %v2385_v14 = vpop.f32.mrb[1].mxu1 }
 0x336   :  { %v2314_v52 = vadd.f32 %v2313_v2, %v2312_v24  ;;  %v2386_v44 = vadd.f32 %v2385_v14, %v2384_v25  ;;  %v2315_v53 = vpop.f32.mrb[2].mxu0  ;;  %v2387_v12 = vpop.f32.mrb[2].mxu1 }
 0x337   :  { %v2316_v5 = vpop.f32.mrb[3].mxu0  ;;  %v2388_v29 = vpop.f32.mrb[3].mxu1 }
 0x338   :  { %v1658_v61 = vadd.f32 %v2314_v52, %v1306_v9  ;;  %v1754_v6 = vadd.f32 %v2386_v44, %v1426_v20  ;;  %v2317_v1 = vadd.f32 %v2316_v5, %v2315_v53  ;;  %v2389_v54 = vadd.f32 %v2388_v29, %v2387_v12  ;;  %v1451_v9 = vpop.permute.xlu1 %1450 }
 0x33a   :  { %v1661_v18 = vadd.f32 %v2317_v1, %v1311_v49  ;;  %v1757_v4 = vadd.f32 %v2389_v54, %v1431_v15  ;;  %v1784_v41 = vmax.f32 %v1658_v61, 0.0  ;;  %v1808_v22 = vmax.f32 %v1754_v6, 0.0  ;;  %v3562_v49 = vpop.permute.xlu0 %1365 }
 0x33c   :  { %v1785_v35 = vmax.f32 %v1661_v18, 0.0  ;;  %v1809_v59 = vmax.f32 %v1757_v4, 0.0  ;;  %v2318_v17 = vpop.f32.mrb[4].mxu0  ;;  %v2390_v3 = vpop.f32.mrb[4].mxu1 }
 0x33d   :  { %v2319_v28 = vpop.f32.mrb[5].mxu0  ;;  %v2391_v16 = vpop.f32.mrb[5].mxu1 }
 0x33e   :  { %v3558_v39 = vpack.c.bf16 %v1785_v35, %v1784_v41  ;;  %v2320_v43 = vadd.f32 %v2319_v28, %v2318_v17  ;;  %v2392_v0 = vadd.f32 %v2391_v16, %v2390_v3  ;;  %v2321_v50 = vpop.f32.mrb[6].mxu0  ;;  %v2393_v37 = vpop.f32.mrb[6].mxu1  ;;  %v3560_v31 = vpack.c.bf16 %v1809_v59, %v1808_v22 }
 0x33f   :  { %v2322_v30 = vpop.f32.mrb[7].mxu0  ;;  %v2394_v42 = vpop.f32.mrb[7].mxu1 }
 0x340   :  { %v1666_v38 = vadd.f32 %v2320_v43, %v1316_v46  ;;  %v1762_v26 = vadd.f32 %v2392_v0, %v1436_v32  ;;  %v2323_v56 = vadd.f32 %v2322_v30, %v2321_v50  ;;  %v2395_v63 = vadd.f32 %v2394_v42, %v2393_v37  ;;  %v1371_v4 = vpop.permute.xlu1 %1370  ;;  %v1456_v41 = vpop.permute.xlu0 %1455 }
 0x342   :  { %v1669_v7 = vadd.f32 %v2323_v56, %v1321_v60  ;;  %v1765_v23 = vadd.f32 %v2395_v63, %v1441_v47  ;;  %v1786_v20 = vmax.f32 %v1666_v38, 0.0  ;;  %v1810_v15 = vmax.f32 %v1762_v26, 0.0 }
 0x344   :  { %v1787_v8 = vmax.f32 %v1669_v7, 0.0  ;;  %v1811_v24 = vmax.f32 %v1765_v23, 0.0  ;;  %v2324_v25 = vpop.f32.mrb[8].mxu0  ;;  %v2396_v2 = vpop.f32.mrb[8].mxu1 }
 0x345   :  { %v2325_v14 = vpop.f32.mrb[9].mxu0  ;;  %v2397_v52 = vpop.f32.mrb[9].mxu1 }
 0x346   :  { %v3564_v44 = vpack.c.bf16 %v1787_v8, %v1786_v20  ;;  %v2326_v53 = vadd.f32 %v2325_v14, %v2324_v25  ;;  %v2398_v46 = vadd.f32 %v2397_v52, %v2396_v2  ;;  %v2327_v32 = vpop.f32.mrb[10].mxu0  ;;  %v2399_v12 = vpop.f32.mrb[10].mxu1  ;;  %v3566_v5 = vpack.c.bf16 %v1811_v24, %v1810_v15 }
 0x347   :  { %v2328_v60 = vpop.f32.mrb[11].mxu0  ;;  %v2400_v47 = vpop.f32.mrb[11].mxu1 }
 0x348   :  { %v1674_v29 = vadd.f32 %v2326_v53, %v3538_v27  ;;  %v1770_v61 = vadd.f32 %v2398_v46, %v1446_v45  ;;  %v2329_v6 = vadd.f32 %v2328_v60, %v2327_v32  ;;  %v2401_v1 = vadd.f32 %v2400_v47, %v2399_v12  ;;  %v1461_v7 = vpop.permute.xlu1 %1460 }
 0x34a   :  { %v1677_v54 = vadd.f32 %v2329_v6, %v3540_v21  ;;  %v1773_v18 = vadd.f32 %v2401_v1, %v1451_v9  ;;  %v1788_v22 = vmax.f32 %v1674_v29, 0.0  ;;  %v1812_v35 = vmax.f32 %v1770_v61, 0.0 }
 0x34c   :  { %v1789_v59 = vmax.f32 %v1677_v54, 0.0  ;;  %v1813_v17 = vmax.f32 %v1773_v18, 0.0  ;;  %v2330_v3 = vpop.f32.mrb[12].mxu0  ;;  %v2402_v28 = vpop.f32.mrb[12].mxu1 }
 0x34d   :  { %v2331_v16 = vpop.f32.mrb[13].mxu0  ;;  %v2403_v43 = vpop.f32.mrb[13].mxu1 }
 0x34e   :  { %v3570_v0 = vpack.c.bf16 %v1789_v59, %v1788_v22  ;;  %v2332_v50 = vadd.f32 %v2331_v16, %v2330_v3  ;;  %v2404_v27 = vadd.f32 %v2403_v43, %v2402_v28  ;;  %v2333_v45 = vpop.f32.mrb[14].mxu0  ;;  %v2405_v37 = vpop.f32.mrb[14].mxu1  ;;  %v3572_v30 = vpack.c.bf16 %v1813_v17, %v1812_v35 }
 0x34f   :  { %v2334_v21 = vpop.f32.mrb[15].mxu0  ;;  %v2406_v42 = vpop.f32.mrb[15].mxu1 }
 0x350   :  { %v1682_v38 = vadd.f32 %v2332_v50, %v3546_v19  ;;  %v1778_v26 = vadd.f32 %v2404_v27, %v1456_v41  ;;  %v2335_v56 = vadd.f32 %v2334_v21, %v2333_v45  ;;  %v2407_v63 = vadd.f32 %v2406_v42, %v2405_v37 }
 0x352   :  { %v1685_v23 = vadd.f32 %v2335_v56, %v3548_v36  ;;  %v1781_v9 = vadd.f32 %v2407_v63, %v1461_v7  ;;  %v1790_v20 = vmax.f32 %v1682_v38, 0.0  ;;  %v1814_v15 = vmax.f32 %v1778_v26, 0.0  ;;  %v1376_v56 = vpop.permute.xlu0 %1375 }
 0x354   :  { %v1791_v8 = vmax.f32 %v1685_v23, 0.0  ;;  %v1815_v24 = vmax.f32 %v1781_v9, 0.0  ;;  %v2336_v25 = vpop.f32.mrb[16].mxu0  ;;  %v1381_v9 = vpop.permute.xlu1 %1380 }
 0x355   :  { %v2337_v2 = vpop.f32.mrb[17].mxu0 }
 0x356   :  { %v3576_v14 = vpack.c.bf16 %v1791_v8, %v1790_v20  ;;  %v2338_v52 = vadd.f32 %v2337_v2, %v2336_v25  ;;  %v2339_v53 = vpop.f32.mrb[18].mxu0  ;;  %v3578_v46 = vpack.c.bf16 %v1815_v24, %v1814_v15 }
 0x357   :  { %v2340_v19 = vpop.f32.mrb[19].mxu0 }
 0x358   :  { %v1690_v32 = vadd.f32 %v2338_v52, %v3550_v48  ;;  %v2341_v12 = vadd.f32 %v2340_v19, %v2339_v53 }
 0x35a   :  { %v1693_v60 = vadd.f32 %v2341_v12, %v3552_v11  ;;  %v1792_v36 = vmax.f32 %v1690_v32, 0.0 }
 0x35c   :  { %v1793_v47 = vmax.f32 %v1693_v60, 0.0  ;;  %v2342_v29 = vpop.f32.mrb[20].mxu0 }
 0x35d   :  { %v2343_v61 = vpop.f32.mrb[21].mxu0 }
 0x35e   :  { %v3582_v6 = vpack.c.bf16 %v1793_v47, %v1792_v36  ;;  %v2344_v1 = vadd.f32 %v2343_v61, %v2342_v29  ;;  %v2345_v54 = vpop.f32.mrb[22].mxu0 }
 0x35f   :  { %v2346_v18 = vpop.f32.mrb[23].mxu0 }
 0x360   :  { %v1698_v41 = vadd.f32 %v2344_v1, %v3554_v51  ;;  %v2347_v22 = vadd.f32 %v2346_v18, %v2345_v54 }
 0x362   :  { %v1701_v35 = vadd.f32 %v2347_v22, %v3556_v55  ;;  %v1794_v59 = vmax.f32 %v1698_v41, 0.0 }
 0x364   :  { %v1795_v17 = vmax.f32 %v1701_v35, 0.0  ;;  %v2348_v48 = vpop.f32.mrb[24].mxu0 }
 0x365   :  { %v2349_v3 = vpop.f32.mrb[25].mxu0 }
 0x366   :  { %v3586_v28 = vpack.c.bf16 %v1795_v17, %v1794_v59  ;;  %v2350_v11 = vadd.f32 %v2349_v3, %v2348_v48  ;;  %v2351_v16 = vpop.f32.mrb[26].mxu0 }
 0x367   :  { %v2352_v43 = vpop.f32.mrb[27].mxu0 }
 0x368   :  { %v1706_v50 = vadd.f32 %v2350_v11, %v3562_v49  ;;  %v2353_v27 = vadd.f32 %v2352_v43, %v2351_v16 }
 0x36a   :  { %v1709_v45 = vadd.f32 %v2353_v27, %v1371_v4  ;;  %v1796_v37 = vmax.f32 %v1706_v50, 0.0 }
 0x36c   :  { %v1797_v21 = vmax.f32 %v1709_v45, 0.0  ;;  %v2354_v42 = vpop.f32.mrb[28].mxu0 }
 0x36d   :  { %v2355_v51 = vpop.f32.mrb[29].mxu0 }
 0x36e   :  { %v3589_v38 = vpack.c.bf16 %v1797_v21, %v1796_v37  ;;  %v2356_v55 = vadd.f32 %v2355_v51, %v2354_v42  ;;  %v2357_v26 = vpop.f32.mrb[30].mxu0 }
 0x36f   :  { %v2358_v63 = vpop.f32.mrb[31].mxu0 }
 0x370   :  { %v1714_v7 = vadd.f32 %v2356_v55, %v1376_v56  ;;  %v2359_v23 = vadd.f32 %v2358_v63, %v2357_v26  ;;  %v1851_v63 = vpop.permute.xlu0 %1850 }
 0x372   :  { %v1717_v20 = vadd.f32 %v2359_v23, %v1381_v9  ;;  %v1798_v15 = vmax.f32 %v1714_v7, 0.0 }
 0x374   :  { %v1799_v8 = vmax.f32 %v1717_v20, 0.0  ;;  %v2360_v24 = vpop.f32.mrb[32].mxu0  ;;  %v1856_v20 = vpop.permute.xlu1 %1855 }
 0x375   :  { %v2361_v49 = vpop.f32.mrb[33].mxu0 }
 0x376   :  { %v1823_v25 = vpack.c.bf16 %v1799_v8, %v1798_v15  ;;  %v2362_v4 = vadd.f32 %v2361_v49, %v2360_v24  ;;  %v2363_v2 = vpop.f32.mrb[34].mxu0 }
 0x377   :  { %v2364_v52 = vpop.f32.mrb[35].mxu0 }
 0x378   :  { %v1722_v53 = vadd.f32 %v2362_v4, %v3526_v58  ;;  %v2365_v19 = vadd.f32 %v2364_v52, %v2363_v2 }
 0x37a   :  { %v1725_v32 = vadd.f32 %v2365_v19, %v3528_v13  ;;  %v1800_v12 = vmax.f32 %v1722_v53, 0.0  ;;  %v1861_v53 = vpop.permute.xlu0 %1860 }
 0x37c   :  { %v1801_v60 = vmax.f32 %v1725_v32, 0.0  ;;  %v2366_v36 = vpop.f32.mrb[36].mxu0 }
 0x37d   :  { %v2367_v47 = vpop.f32.mrb[37].mxu0 }
 0x37e   :  { %v2368_v29 = vadd.f32 %v2367_v47, %v2366_v36  ;;  %v2369_v61 = vpop.f32.mrb[38].mxu0  ;;  %v1824_v1 = vpack.c.bf16 %v1801_v60, %v1800_v12  ;;  %v1866_v60 = vpop.permute.xlu1 %1865 }
 0x37f   :  { %v2370_v54 = vpop.f32.mrb[39].mxu0 }
 0x380   :  { %v1730_v18 = vadd.f32 %v2368_v29, %v3530_v33  ;;  %v2371_v41 = vadd.f32 %v2370_v54, %v2369_v61  ;;  %2408 = vmatprep.subr.bf16.mxu1 %v1824_v1 }
 0x381   :  { %2409 = vmatpush3.bf16.msra.mxu1 %v3558_v39 }
 0x382   :  { %v1733_v22 = vadd.f32 %v2371_v41, %v3532_v34  ;;  %v1802_v58 = vmax.f32 %v1730_v18, 0.0 }
 0x384   :  { %v1803_v35 = vmax.f32 %v1733_v22, 0.0  ;;  %v2372_v59 = vpop.f32.mrb[40].mxu0  ;;  %v1871_v22 = vpop.permute.xlu0 %1870 }
 0x385   :  { %v2373_v13 = vpop.f32.mrb[41].mxu0 }
 0x386   :  { %v2374_v17 = vadd.f32 %v2373_v13, %v2372_v59  ;;  %v2375_v48 = vpop.f32.mrb[42].mxu0  ;;  %v1825_v3 = vpack.c.bf16 %v1803_v35, %v1802_v58  ;;  %v1876_v13 = vpop.permute.xlu1 %1875 }
 0x387   :  { %v2376_v11 = vpop.f32.mrb[43].mxu0 }
 0x388   :  { %v1738_v16 = vadd.f32 %v2374_v17, %v3534_v40  ;;  %v2377_v43 = vadd.f32 %v2376_v11, %v2375_v48  ;;  %2410 = vmatprep.subr.bf16.mxu1 %v1825_v3 }
 0x389   :  { %2411 = vmatpush3.bf16.msra.mxu1 %v3564_v44 }
 0x38a   :  { %v1741_v33 = vadd.f32 %v2377_v43, %v3536_v57  ;;  %v1804_v50 = vmax.f32 %v1738_v16, 0.0  ;;  %v2575_v57 = vld [vmem:[#allocation15] ss:$8 sps:$4 sm:$0xff]  }
 0x38c   :  { %v1805_v39 = vmax.f32 %v1741_v33, 0.0  ;;  %v2378_v27 = vpop.f32.mrb[44].mxu0 }
 0x38d   :  { %v2379_v34 = vpop.f32.mrb[45].mxu0 }
 0x38e   :  { %v2380_v45 = vadd.f32 %v2379_v34, %v2378_v27  ;;  %v2381_v37 = vpop.f32.mrb[46].mxu0  ;;  %v1826_v21 = vpack.c.bf16 %v1805_v39, %v1804_v50  ;;  %v1881_v39 = vpop.permute.xlu0 %1880 }
 0x38f   :  { %v2382_v42 = vpop.f32.mrb[47].mxu0 }
 0x390   :  { %v1746_v51 = vadd.f32 %v2380_v45, %v3542_v62  ;;  %v2383_v55 = vadd.f32 %v2382_v42, %v2381_v37  ;;  %2412 = vmatprep.subr.bf16.mxu1 %v1826_v21  ;;  %v2578_v62 = vld [vmem:[#allocation15 + $0x14] ss:$8 sps:$4 sm:$0xff]   ;;  %v1886_v37 = vpop.permute.xlu1 %1885 }
 0x391   :  { %2413 = vmatpush3.bf16.msra.mxu1 %v3570_v0  ;;  %v2581_v0 = vld [vmem:[#allocation15 + $0x24] ss:$8 sps:$4 sm:$0xff]  }
 0x392   :  { %v1749_v40 = vadd.f32 %v2383_v55, %v3544_v10  ;;  %v1806_v26 = vmax.f32 %v1746_v51, 0.0  ;;  %v2580_v10 = vld [vmem:[#allocation15 + $0x10] ss:$8 sps:$4 sm:$0xff]  }
 0x394   :  { %v1807_v44 = vmax.f32 %v1749_v40, 0.0  ;;  %v2588_v40 = vld [vmem:[#allocation18 + $0x8] sm:$0xff]  }
 0x396   :  { %v1827_v56 = vpack.c.bf16 %v1807_v44, %v1806_v26  ;;  %v2589_v26 = vld [vmem:[#allocation18 + $0x10] sm:$0xff]   ;;  %v2590_v44 = vld [vmem:[#allocation18 + $0x18] sm:$0xff]  }
 0x398   :  { %2414 = vmatprep.subr.bf16.mxu1 %v1827_v56  ;;  %v2912_v56 = vmov 0.0  }
 0x399   :  { %2415 = vmatpush3.bf16.msra.mxu1 %v3576_v14  ;;  %v2584_v14 = vld [vmem:[#allocation15 + $0x34] ss:$8 sps:$4 sm:$0xff]  }
 0x39a   :  { %2416 = vmatprep.subr.bf16.mxu1 %v3560_v31  ;;  %v2583_v31 = vld [vmem:[#allocation15 + $0x20] ss:$8 sps:$4 sm:$0xff]  }
 0x39d   :  { %2417 = vmatpush3.bf16.msra.mxu1 %v3582_v6 }
 0x39e   :  { %2418 = vmatprep.subr.bf16.mxu1 %v3566_v5  ;;  %v2586_v5 = vld [vmem:[#allocation15 + $0x30] ss:$8 sps:$4 sm:$0xff]  }
 0x3a1   :  { %2419 = vmatpush3.bf16.msra.mxu1 %v3586_v28 }
 0x3a2   :  { %2420 = vmatprep.subr.bf16.mxu1 %v3572_v30  ;;  %v2587_v30 = vld [vmem:[#allocation18] sm:$0xff]  }
 0x3a5   :  { %2421 = vmatpush3.bf16.msra.mxu1 %v3589_v38 }
 0x3a6   :  { %2422 = vmatprep.subr.bf16.mxu1 %v3578_v46 }
 0x3a9   :  { %2423 = vmatpush3.bf16.msra.mxu1 %v1823_v25 }
 0x3ac   :  { %1961 = vmatmul.mubr.bf16.vlgmr.msra.gmra.mrb[16].mxu1 %v2575_v57  ;;  %v2024_v57 = vpop.permute.xlu0 %2023 }
 0x3ad   :  { %1968 = vmatprep.mubr.bf16.mxu1 %v2578_v62  ;;  %v2029_v62 = vpop.permute.xlu1 %2028 }
 0x3b4   :  { %1969 = vmatmul.mubr.bf16.gmra.mrb[20].mxu1 %v2580_v10  ;;  %v2034_v10 = vpop.permute.xlu0 %2033 }
 0x3b5   :  { %1976 = vmatprep.mubr.bf16.mxu1 %v2581_v0  ;;  %v2039_v0 = vpop.permute.xlu1 %2038 }
 0x3bc   :  { %1977 = vmatmul.mubr.bf16.gmra.mrb[24].mxu1 %v2583_v31 }
 0x3bd   :  { %1984 = vmatprep.mubr.bf16.mxu1 %v2584_v14 }
 0x3c4   :  { %1985 = vmatmul.mubr.bf16.gmra.mrb[28].mxu1 %v2586_v5 }
 0x3c5   :  { %2469 = vmatprep.mubr.msk.bf16.mxu1 %vm2081_vm2, %v2587_v30  ;;  %v2044_v30 = vpop.permute.xlu0 %2043 }
 0x47f   :  { %v2424_v46 = vpop.f32.mrb[16].mxu1 }
 0x480   :  { %v2425_v6 = vpop.f32.mrb[17].mxu1 }
 0x481   :  { %v2426_v28 = vadd.f32 %v2425_v6, %v2424_v46  ;;  %v2427_v38 = vpop.f32.mrb[18].mxu1 }
 0x482   :  { %v2428_v7 = vpop.f32.mrb[19].mxu1 }
 0x483   :  { %v1963_v23 = vadd.f32 %v2426_v28, %v1851_v63  ;;  %v2429_v9 = vadd.f32 %v2428_v7, %v2427_v38  ;;  %v2049_v63 = vpop.permute.xlu1 %2048 }
 0x485   :  { %v1966_v15 = vadd.f32 %v2429_v9, %v1856_v20  ;;  %v1993_v8 = vmax.f32 %v1963_v23, 0.0 }
 0x487   :  { %v1994_v24 = vmax.f32 %v1966_v15, 0.0  ;;  %v2430_v49 = vpop.f32.mrb[20].mxu1 }
 0x488   :  { %v2431_v25 = vpop.f32.mrb[21].mxu1 }
 0x489   :  { %v2432_v4 = vadd.f32 %v2431_v25, %v2430_v49  ;;  %v2433_v2 = vpop.f32.mrb[22].mxu1  ;;  %v2001_v52 = vpack.c.bf16 %v1994_v24, %v1993_v8  ;;  %v2054_v24 = vpop.permute.xlu0 %2053 }
 0x48a   :  { %v2434_v19 = vpop.f32.mrb[23].mxu1 }
 0x48b   :  { %v1971_v32 = vadd.f32 %v2432_v4, %v1861_v53  ;;  %v2435_v12 = vadd.f32 %v2434_v19, %v2433_v2  ;;  %2461 = vmatprep.subr.bf16.mxu1 %v2001_v52 }
 0x48c   :  { %2462 = vmatpush3.bf16.msra.mxu1 %v2001_v52  ;;  %v2059_v52 = vpop.permute.xlu1 %2058 }
 0x48d   :  { %v1974_v36 = vadd.f32 %v2435_v12, %v1866_v60  ;;  %v1995_v47 = vmax.f32 %v1971_v32, 0.0 }
 0x48f   :  { %v1996_v29 = vmax.f32 %v1974_v36, 0.0  ;;  %v2436_v61 = vpop.f32.mrb[24].mxu1 }
 0x490   :  { %v2437_v1 = vpop.f32.mrb[25].mxu1 }
 0x491   :  { %v2438_v54 = vadd.f32 %v2437_v1, %v2436_v61  ;;  %v2439_v18 = vpop.f32.mrb[26].mxu1  ;;  %v2002_v41 = vpack.c.bf16 %v1996_v29, %v1995_v47 }
 0x492   :  { %v2440_v58 = vpop.f32.mrb[27].mxu1 }
 0x493   :  { %v1979_v35 = vadd.f32 %v2438_v54, %v1871_v22  ;;  %v2441_v59 = vadd.f32 %v2440_v58, %v2439_v18  ;;  %2463 = vmatprep.subr.bf16.mxu1 %v2002_v41  ;;  %v2171_v18 = vld [vmem:[#allocation21] sm:$0x1] }
 0x494   :  { %2464 = vmatpush3.bf16.msra.mxu1 %v2002_v41  ;;  %v2178_v41 = vlaneseq }
 0x495   :  { %v1982_v17 = vadd.f32 %v2441_v59, %v1876_v13  ;;  %v1997_v48 = vmax.f32 %v1979_v35, 0.0  ;;  %v2176_v35 = vpop.permute.xlu0 %2175 }
 0x496   :  { %v2179_v22 = vshrl.u32 %v2178_v41, 7 }
 0x497   :  { %v1998_v3 = vmax.f32 %v1982_v17, 0.0  ;;  %v2442_v11 = vpop.f32.mrb[28].mxu1 }
 0x498   :  { %v2443_v16 = vpop.f32.mrb[29].mxu1  ;;  %v2180_v58 = vsub.s32 0, %v2179_v22 }
 0x499   :  { %v2444_v43 = vadd.f32 %v2443_v16, %v2442_v11  ;;  %v2445_v33 = vpop.f32.mrb[30].mxu1  ;;  %v2003_v50 = vpack.c.bf16 %v1998_v3, %v1997_v48 }
 0x49a   :  { %v2446_v27 = vpop.f32.mrb[31].mxu1  ;;  %v2181_v59 = vrot.slane %v2176_v35, %v2180_v58 }
 0x49b   :  { %v1987_v34 = vadd.f32 %v2444_v43, %v1881_v39  ;;  %v2447_v45 = vadd.f32 %v2446_v27, %v2445_v33  ;;  %2465 = vmatprep.subr.bf16.mxu1 %v2003_v50 }
 0x49c   :  { %2466 = vmatpush3.bf16.msra.mxu1 %v2003_v50 }
 0x49d   :  { %v1990_v21 = vadd.f32 %v2447_v45, %v1886_v37  ;;  %v1999_v42 = vmax.f32 %v1987_v34, 0.0 }
 0x49f   :  { %v2000_v51 = vmax.f32 %v1990_v21, 0.0 }
 0x4a1   :  { %v2004_v55 = vpack.c.bf16 %v2000_v51, %v1999_v42 }
 0x4a3   :  { %2467 = vmatprep.subr.bf16.mxu1 %v2004_v55 }
 0x4a4   :  { %2468 = vmatpush3.bf16.msra.mxu1 %v2004_v55 }
 0x4a5   :  { %2477 = vmatprep.subr.bf16.mxu1 %v2912_v56 }
 0x4a7   :  { %2470 = vmatmul.mubr.msk.bf16.vlgmr.msra.gmra.mrb[32].mxu1 %vm2081_vm2, %v2588_v40 }
 0x4a8   :  { %2473 = vmatprep.mubr.msk.bf16.mxu1 %vm2081_vm2, %v2589_v26 }
 0x4af   :  { %2474 = vmatmul.mubr.msk.bf16.gmra.mrb[36].mxu1 %vm2081_vm2, %v2590_v44 }
 0x4b0   :  { %2485 = vmatprep.mubr.msk.bf16.mxu1 %vm2913_vm3, %v2912_v56 }
 0x57a   :  { %v2471_v31 = vpop.f32.mrb[32].mxu1 }
 0x57b   :  { %v2137_v14 = vadd.f32 %v2471_v31, %v2034_v10  ;;  %v2128_v5 = vpop.f32.mrb[33].mxu1 }
 0x57c   :  { %v2129_v46 = vadd.f32 %v2128_v5, %v2024_v57  ;;  %v2472_v6 = vpop.f32.mrb[34].mxu1 }
 0x57d   :  { %v2140_v28 = vadd.f32 %v2472_v6, %v2039_v0  ;;  %v2131_v38 = vpop.f32.mrb[35].mxu1  ;;  %v2161_v23 = vmax.f32 %v2137_v14, 0.0 }
 0x57e   :  { %v2132_v7 = vadd.f32 %v2131_v38, %v2029_v62  ;;  %v2159_v20 = vmax.f32 %v2129_v46, 0.0 }
 0x57f   :  { %v2162_v9 = vmax.f32 %v2140_v28, 0.0 }
 0x580   :  { %v2160_v15 = vmax.f32 %v2132_v7, 0.0 }
 0x581   :  { %v2168_v8 = vpack.c.bf16 %v2162_v9, %v2161_v23 }
 0x582   :  { %v2167_v49 = vpack.c.bf16 %v2160_v15, %v2159_v20  ;;  %v2475_v25 = vpop.f32.mrb[36].mxu1 }
 0x583   :  { %v2153_v4 = vadd.f32 %v2475_v25, %v2054_v24  ;;  %v2144_v2 = vpop.f32.mrb[37].mxu1 }
 0x584   :  { %v2145_v53 = vadd.f32 %v2144_v2, %v2044_v30  ;;  %v2476_v19 = vpop.f32.mrb[38].mxu1  ;;  %2478 = vmatpush3.bf16.msra.mxu1 %v2167_v49 }
 0x585   :  { %v2156_v32 = vadd.f32 %v2476_v19, %v2059_v52  ;;  %v2147_v12 = vpop.f32.mrb[39].mxu1  ;;  %2479 = vmatprep.subr.bf16.mxu1 %v2912_v56  ;;  %v2165_v36 = vmax.f32 %v2153_v4, 0.0 }
 0x586   :  { %v2148_v60 = vadd.f32 %v2147_v12, %v2049_v63  ;;  %v2163_v29 = vmax.f32 %v2145_v53, 0.0 }
 0x587   :  { %v2166_v47 = vmax.f32 %v2156_v32, 0.0 }
 0x588   :  { %v2164_v61 = vmax.f32 %v2148_v60, 0.0  ;;  %2480 = vmatpush3.bf16.msra.mxu1 %v2168_v8 }
 0x589   :  { %v2170_v1 = vpack.c.bf16 %v2166_v47, %v2165_v36  ;;  %2481 = vmatprep.subr.bf16.mxu1 %v2912_v56 }
 0x58a   :  { %v2169_v54 = vpack.c.bf16 %v2164_v61, %v2163_v29 }
 0x58c   :  { %2482 = vmatpush3.bf16.msra.mxu1 %v2169_v54 }
 0x58d   :  { %2483 = vmatprep.subr.bf16.mxu1 %v2912_v56 }
 0x590   :  { %2484 = vmatpush3.bf16.msra.mxu1 %v2170_v1 }
 0x593   :  { %2486 = vmatmul.mubr.msk.bf16.vlgmr.msra.gmra.mrb[40].mxu1 %vm2081_vm2, %v2171_v18 }
 0x666   :  { %v2219_v13 = vpop.f32.mrb[40].mxu1 }
 0x667   :  { %v2220_v17 = vadd.f32 %v2219_v13, %v2181_v59  ;;  %v2487_v48 = vpop.f32.mrb[41].mxu1 }
 0x668   :  { %v2222_v3 = vpop.f32.mrb[42].mxu1 }
 0x669   :  { %2225 = vst [vmem:[#allocation23] sm:$0x1] %v2220_v17  ;;  %v2488_v11 = vpop.f32.mrb[43].mxu1 }
 0x66a   :  { %2868 = shalt.err (!%p2865_p2)
}
 0x66b   :  { %s2869_s24 = scalar_lea.hbm %s3640_s13, 16 }
 0x66c   :  { %p2870_p3 = scmp.ne.s32.totalorder %s3640_s13, %s2869_s24  ;;  %p2873_p4 = scmp.lt.u32.totalorder %s2869_s24, %s3640_s13 }
 0x66e   :  { %p2875_p5 = pnand %p2873_p4, %p2870_p3 }
 0x670   :  { %2878 = shalt.err (!%p2875_p5)
}
 0x671   :  { %2235 = dma.vmem_to_hbm [thread:$0]  %s2233_s27, 16, %s3640_s13, [#allocation5]  }
 0x672   :  { %2893 = dma.done.wait [#allocation5], 16  }
 0x673   :  { %2894 = vsyncadd [#allocation5], 4294967280 }
 0x674   :  { %2239 = vsyncpa [#allocation4], 1 }
 0x675   :  { %2240 = vsyncpa [#allocation7], 1 }
 0x676   :  { %2241 = vsyncpa [#allocation10], 1 }
 0x677   :  { %2242 = vsyncpa [#allocation13], 1 }
 0x678   :  { %2243 = vsyncpa [#allocation16], 1 }
 0x679   :  { %2244 = vsyncpa [#allocation19], 1 }
 0x67a   :  { %2245 = vsyncpa [#allocation22], 1 }
 0x67b   :  { %2246 = vsyncpa [#allocation5], 1 }

</bundles_post_ra>
